<compile_context>
chip_gen: v5e
topology: v5e:2x2
jax: 0.10.0
libtpu: 0.0.40
codegen_flags: <defaults>
</compile_context>

<pallas_src>
from functools import partial

import jax
import jax.numpy as jnp
from jax.experimental import pallas as pl
from jax.experimental.pallas import tpu as pltpu

# ----------------------------------------------------------------------------
# TrajParamIndex (synthetic but consistent with how the module uses it):
#   7 motion params, 2 yaw params, 3 dimension params, 4 classification params.
X, Y, Z, VX, VY, AX, AY = 0, 1, 2, 3, 4, 5, 6
COS_YAW, SIN_YAW = 7, 8
LENGTH, WIDTH, HEIGHT = 9, 10, 11
END_OF_INDEX = 16
REG_DIM = HEIGHT + 1                 # 12
CLS_DIM = END_OF_INDEX - REG_DIM     # 4
OUT_PAD = 32                         # packed output lanes: refined(16)+quality(2)+pad(14)

MOTION_RANGE = dict(
    x=(-80.0, 80.0), y=(-80.0, 80.0), z=(-5.0, 5.0),
    vx=(-30.0, 30.0), vy=(-30.0, 30.0), ax=(-10.0, 10.0), ay=(-10.0, 10.0),
    length=(0.5, 25.0), width=(0.3, 5.0), height=(0.5, 6.0),
)
DIM_MINS = (MOTION_RANGE["length"][0], MOTION_RANGE["width"][0], MOTION_RANGE["height"][0])
DIM_MAXS = (MOTION_RANGE["length"][1], MOTION_RANGE["width"][1], MOTION_RANGE["height"][1])

LN_EPS = 1e-5


def _round_up(x, m):
    return ((x + m - 1) // m) * m


# ----------------------------------------------------------------------------
# The Pallas kernel: one row-tile of the whole forward pass.
def trajectory_refiner_kernel(
    content_ref, pos_ref, trajs_ref,           # (TM, QP), (TM, QP), (TM, 32)
    w_in_ref, b_in_ref,                        # (QP, 3*HP), (1, 3*HP)   fused first Linears
    w_hid_ref, b_hid_ref,                      # (5, HP, HP), (5, HP)    [reg_l2, reg_l3, reg_l4, cls_l2, q_l2]
    ln_g_ref, ln_b_ref,                        # (6, HP), (6, HP)
    w_out_ref, b_out_ref,                      # (3*HP, 32), (1, 32)     fused block-diagonal output proj
    lo_ref, hi_ref,                            # (1, 32), (1, 32)        clamp bounds (±1e30 outside dims)
    out_ref,                                   # (TM, 32)
    *, hidden_dim, hidden_pad,
):
    f32 = jnp.float32
    HP = hidden_pad

    def lin(x, w, b):
        return jnp.dot(x.astype(w.dtype), w, preferred_element_type=f32) + b

    def relu(x):
        return jnp.maximum(x, 0.0)

    # Masked LayerNorm over the real hidden_dim (padded lanes carry exact zeros).
    lane = jax.lax.broadcasted_iota(jnp.int32, (1, HP), 1)
    ln_mask = (lane < hidden_dim).astype(f32)
    inv_h = 1.0 / float(hidden_dim)

    def ln(x, g, b):
        mu = jnp.sum(x * ln_mask, axis=-1, keepdims=True) * inv_h
        d = (x - mu) * ln_mask
        var = jnp.sum(d * d, axis=-1, keepdims=True) * inv_h
        return d * jax.lax.rsqrt(var + LN_EPS) * g + b

    b_hid = b_hid_ref[...]
    ln_g = ln_g_ref[...]
    ln_b = ln_b_ref[...]

    feat = content_ref[...] + pos_ref[...]                       # (TM, QP) f32

    # ---- fused first Linear of all three heads (one MXU push) ----
    h0 = relu(lin(feat, w_in_ref[...], b_in_ref[...]))           # (TM, 3*HP)
    h_reg = h0[:, 0:HP]
    h_cls = h0[:, HP:2 * HP]
    h_q = h0[:, 2 * HP:3 * HP]

    # ---- reg head: linear_relu_ln(H, 2, 2, Q) ----
    h_reg = relu(lin(h_reg, w_hid_ref[0], b_hid[0:1]))
    h_reg = ln(h_reg, ln_g[0:1], ln_b[0:1])
    h_reg = relu(lin(h_reg, w_hid_ref[1], b_hid[1:2]))
    h_reg = relu(lin(h_reg, w_hid_ref[2], b_hid[2:3]))
    h_reg = ln(h_reg, ln_g[1:2], ln_b[1:2])

    # ---- cls head: linear_relu_ln(H, 1, 2, Q) ----
    h_cls = ln(h_cls, ln_g[2:3], ln_b[2:3])
    h_cls = relu(lin(h_cls, w_hid_ref[3], b_hid[3:4]))
    h_cls = ln(h_cls, ln_g[3:4], ln_b[3:4])

    # ---- quality head: linear_relu_ln(H, 1, 2, Q) ----
    h_q = ln(h_q, ln_g[4:5], ln_b[4:5])
    h_q = relu(lin(h_q, w_hid_ref[4], b_hid[4:5]))
    h_q = ln(h_q, ln_g[5:6], ln_b[5:6])

    # ---- fused output projection (block-diagonal): columns already in final layout
    #      [reg(0:12) | cls(12:16) | quality(16:18) | pad(18:32)] ----
    h_cat = jnp.concatenate([h_reg, h_cls, h_q], axis=-1)        # (TM, 3*HP)
    head = lin(h_cat, w_out_ref[...], b_out_ref[...])            # (TM, 32) f32

    # ---- trajectory refinement: full-width masked arithmetic, one dense store ----
    trajs = trajs_ref[...]                                       # (TM, 32), cols 16.. are zero pad
    col = jax.lax.broadcasted_iota(jnp.int32, (1, OUT_PAD), 1)
    residual = jnp.logical_or(
        col <= AY, jnp.logical_and(col >= LENGTH, col <= HEIGHT))
    out = jnp.where(residual, trajs + head, head)                # residual add x..ay, dims; overwrite rest
    out = jnp.minimum(jnp.maximum(out, lo_ref[...]), hi_ref[...])  # clamps only dims columns
    out_ref[...] = out


# ----------------------------------------------------------------------------
# Build padded / fused kernel parameters from the "logical" parameter dict.
def prepare_kernel_params(params, query_dim, hidden_dim, compute_dtype=jnp.float32):
    f32 = jnp.float32
    QP = _round_up(query_dim, 128)
    HP = _round_up(hidden_dim, 128)

    w_in_f = jnp.zeros((QP, 3 * HP), f32)
    b_in_f = jnp.zeros((1, 3 * HP), f32)
    for i in range(3):
        w_in_f = w_in_f.at[:query_dim, i * HP:i * HP + hidden_dim].set(params["w_in"][i])
        b_in_f = b_in_f.at[0, i * HP:i * HP + hidden_dim].set(params["b_in"][i])

    w_hid = jnp.zeros((5, HP, HP), f32).at[:, :hidden_dim, :hidden_dim].set(params["w_hid"])
    b_hid = jnp.zeros((5, HP), f32).at[:, :hidden_dim].set(params["b_hid"])
    ln_g = jnp.zeros((6, HP), f32).at[:, :hidden_dim].set(params["ln_g"])
    ln_b = jnp.zeros((6, HP), f32).at[:, :hidden_dim].set(params["ln_b"])

    # Block-diagonal output projection: [h_reg | h_cls | h_q] @ w_out -> (.., 32)
    w_out = jnp.zeros((3 * HP, OUT_PAD), f32)
    w_out = w_out.at[0:hidden_dim, 0:REG_DIM].set(params["w_reg"])
    w_out = w_out.at[HP:HP + hidden_dim, REG_DIM:END_OF_INDEX].set(params["w_cls"])
    w_out = w_out.at[2 * HP:2 * HP + hidden_dim, END_OF_INDEX:END_OF_INDEX + 2].set(params["w_q"])
    b_out = jnp.zeros((1, OUT_PAD), f32)
    b_out = b_out.at[0, 0:REG_DIM].set(params["b_reg"])
    b_out = b_out.at[0, REG_DIM:END_OF_INDEX].set(params["b_cls"])
    b_out = b_out.at[0, END_OF_INDEX:END_OF_INDEX + 2].set(params["b_q"])

    # Clamp bounds: only dims columns (LENGTH..HEIGHT) are active.
    lo = jnp.full((1, OUT_PAD), -1e30, f32).at[0, LENGTH:HEIGHT + 1].set(jnp.array(DIM_MINS, f32))
    hi = jnp.full((1, OUT_PAD), 1e30, f32).at[0, LENGTH:HEIGHT + 1].set(jnp.array(DIM_MAXS, f32))

    cd = compute_dtype
    return dict(
        w_in=w_in_f.astype(cd), b_in=b_in_f,
        w_hid=w_hid.astype(cd), b_hid=b_hid,
        ln_g=ln_g, ln_b=ln_b,
        w_out=w_out.astype(cd), b_out=b_out,
        lo=lo, hi=hi,
    )


# ----------------------------------------------------------------------------
# Wrapper: padding, tiling, pallas_call plumbing.
def trajectory_refiner_forward(content_query, pos_query, trajs, params,
                               compute_dtype=jnp.float32, tile_m_max=512):
    B, N, Q = content_query.shape
    H = params["w_in"].shape[-1]
    M = B * N
    QP = _round_up(Q, 128)
    HP = _round_up(H, 128)

    if M <= tile_m_max:
        tile_m = _round_up(max(M, 8), 8)
        m_pad = tile_m
    else:
        tile_m = tile_m_max
        m_pad = _round_up(M, tile_m)

    kp = prepare_kernel_params(params, Q, H, compute_dtype)

    def pad2(x, rows, cols):
        r, c = x.shape
        return jnp.pad(x, ((0, rows - r), (0, cols - c)))

    content = pad2(content_query.reshape(M, Q).astype(jnp.float32), m_pad, QP)
    pos = pad2(pos_query.reshape(M, Q).astype(jnp.float32), m_pad, QP)
    trajs_p = pad2(trajs.reshape(M, END_OF_INDEX).astype(jnp.float32), m_pad, OUT_PAD)

    kernel = partial(trajectory_refiner_kernel, hidden_dim=H, hidden_pad=HP)

    row = lambda c: pl.BlockSpec((tile_m, c), lambda i: (i, 0))
    full2 = lambda a: pl.BlockSpec(a.shape, lambda i: (0, 0))
    full3 = lambda a: pl.BlockSpec(a.shape, lambda i: (0, 0, 0))

    in_specs = [
        row(QP), row(QP), row(OUT_PAD),
        full2(kp["w_in"]), full2(kp["b_in"]),
        full3(kp["w_hid"]), full2(kp["b_hid"]),
        full2(kp["ln_g"]), full2(kp["ln_b"]),
        full2(kp["w_out"]), full2(kp["b_out"]),
        full2(kp["lo"]), full2(kp["hi"]),
    ]

    out = pl.pallas_call(
        kernel,
        grid=(m_pad // tile_m,),
        in_specs=in_specs,
        out_specs=pl.BlockSpec((tile_m, OUT_PAD), lambda i: (i, 0)),
        out_shape=jax.ShapeDtypeStruct((m_pad, OUT_PAD), jnp.float32),
        compiler_params=pltpu.CompilerParams(dimension_semantics=("parallel",)),
    )(content, pos, trajs_p,
      kp["w_in"], kp["b_in"], kp["w_hid"], kp["b_hid"],
      kp["ln_g"], kp["ln_b"], kp["w_out"], kp["b_out"],
      kp["lo"], kp["hi"])

    refined = out[:M, :END_OF_INDEX].reshape(B, N, END_OF_INDEX)
    quality = out[:M, END_OF_INDEX:END_OF_INDEX + 2].reshape(B, N, 2)
    return refined, quality


# ----------------------------------------------------------------------------
# Deterministic parameter init (xavier-normal weights, zero biases, LN gamma=1/beta=0).
def init_params(key, query_dim, hidden_dim):
    def xavier(k, shape):
        fan_in, fan_out = shape[-2], shape[-1]
        std = (2.0 / (fan_in + fan_out)) ** 0.5
        return std * jax.random.normal(k, shape, dtype=jnp.float32)

    ks = jax.random.split(key, 8)
    return dict(
        w_in=xavier(ks[0], (3, query_dim, hidden_dim)),
        b_in=jnp.zeros((3, hidden_dim), jnp.float32),
        w_hid=xavier(ks[1], (5, hidden_dim, hidden_dim)),
        b_hid=jnp.zeros((5, hidden_dim), jnp.float32),
        ln_g=jnp.ones((6, hidden_dim), jnp.float32),
        ln_b=jnp.zeros((6, hidden_dim), jnp.float32),
        w_reg=xavier(ks[2], (hidden_dim, REG_DIM)),
        b_reg=jnp.zeros((REG_DIM,), jnp.float32),
        w_cls=xavier(ks[3], (hidden_dim, CLS_DIM)),
        b_cls=jnp.zeros((CLS_DIM,), jnp.float32),
        w_q=xavier(ks[4], (hidden_dim, 2)),
        b_q=jnp.zeros((2,), jnp.float32),
    )


# ----------------------------------------------------------------------------
# Pure-JAX reference (mirrors the PyTorch forward), unpadded f32.
def _ln_ref(x, g, b, eps=LN_EPS):
    mu = jnp.mean(x, axis=-1, keepdims=True)
    var = jnp.mean((x - mu) ** 2, axis=-1, keepdims=True)
    return (x - mu) * jax.lax.rsqrt(var + eps) * g + b


def _relu_ref(x):
    return jnp.maximum(x, 0.0)


def reference_forward(content_query, pos_query, trajs, params):
    B, N, Q = content_query.shape
    feat = (content_query + pos_query).reshape(B * N, Q)
    t = trajs.reshape(B * N, END_OF_INDEX)
    p = params

    h = _relu_ref(feat @ p["w_in"][0] + p["b_in"][0])
    h = _relu_ref(h @ p["w_hid"][0] + p["b_hid"][0])
    h = _ln_ref(h, p["ln_g"][0], p["ln_b"][0])
    h = _relu_ref(h @ p["w_hid"][1] + p["b_hid"][1])
    h = _relu_ref(h @ p["w_hid"][2] + p["b_hid"][2])
    h = _ln_ref(h, p["ln_g"][1], p["ln_b"][1])
    reg_out = h @ p["w_reg"] + p["b_reg"]

    h = _relu_ref(feat @ p["w_in"][1] + p["b_in"][1])
    h = _ln_ref(h, p["ln_g"][2], p["ln_b"][2])
    h = _relu_ref(h @ p["w_hid"][3] + p["b_hid"][3])
    h = _ln_ref(h, p["ln_g"][3], p["ln_b"][3])
    cls_out = h @ p["w_cls"] + p["b_cls"]

    h = _relu_ref(feat @ p["w_in"][2] + p["b_in"][2])
    h = _ln_ref(h, p["ln_g"][4], p["ln_b"][4])
    h = _relu_ref(h @ p["w_hid"][4] + p["b_hid"][4])
    h = _ln_ref(h, p["ln_g"][5], p["ln_b"][5])
    quality = h @ p["w_q"] + p["b_q"]

    motion = t[:, :AY + 1] + reg_out[:, :AY + 1]
    yaw = reg_out[:, COS_YAW:SIN_YAW + 1]
    dims = t[:, LENGTH:HEIGHT + 1] + reg_out[:, LENGTH:HEIGHT + 1]
    dims = jnp.clip(dims, jnp.array(DIM_MINS), jnp.array(DIM_MAXS))
    refined = jnp.concatenate([motion, yaw, dims, cls_out], axis=-1)
    return refined.reshape(B, N, END_OF_INDEX), quality.reshape(B, N, 2)


# ----------------------------------------------------------------------------
if __name__ == "__main__":
    key = jax.random.PRNGKey(0)
    B, N = 2, 8
    QUERY_DIM, HIDDEN_DIM = 32, 32

    kp, kc, kpos, kt = jax.random.split(key, 4)
    params = init_params(kp, QUERY_DIM, HIDDEN_DIM)

    content_query = jax.random.normal(kc, (B, N, QUERY_DIM), jnp.float32)
    pos_query = jax.random.normal(kpos, (B, N, QUERY_DIM), jnp.float32)
    trajs = jax.random.normal(kt, (B, N, END_OF_INDEX), jnp.float32)

    # f32 matmul path: must match the reference tightly.
    fwd_f32 = jax.jit(trajectory_refiner_forward)
    refined, quality = fwd_f32(content_query, pos_query, trajs, params)
    jax.block_until_ready((refined, quality))

    ref_refined, ref_quality = reference_forward(content_query, pos_query, trajs, params)
    assert refined.shape == (B, N, END_OF_INDEX)
    assert quality.shape == (B, N, 2)
    assert jnp.allclose(refined, ref_refined, atol=1e-4, rtol=1e-4)
    assert jnp.allclose(quality, ref_quality, atol=1e-4, rtol=1e-4)

    # bf16 matmul path (f32 accumulation, f32 LayerNorm): sanity check only.
    fwd_bf16 = jax.jit(partial(trajectory_refiner_forward, compute_dtype=jnp.bfloat16))
    refined_bf, quality_bf = fwd_bf16(content_query, pos_query, trajs, params)
    jax.block_until_ready((refined_bf, quality_bf))
    assert refined_bf.shape == (B, N, END_OF_INDEX) and quality_bf.shape == (B, N, 2)
    assert bool(jnp.all(jnp.isfinite(refined_bf))) and bool(jnp.all(jnp.isfinite(quality_bf)))
    assert float(jnp.max(jnp.abs(refined_bf - ref_refined))) < 0.25
    assert float(jnp.max(jnp.abs(quality_bf - ref_quality))) < 0.25

    print("KERNEL_OK")
</pallas_src>

<mosaic_0001>
module attributes {stable_mosaic.version = 11 : i64} {
  func.func @trajectory_refiner_kernel(%arg0: i32, %arg1: memref<16x128xf32, #tpu.memory_space<vmem>>, %arg2: memref<16x128xf32, #tpu.memory_space<vmem>>, %arg3: memref<16x32xf32, #tpu.memory_space<vmem>>, %arg4: memref<128x384xf32, #tpu.memory_space<vmem>>, %arg5: memref<1x384xf32, #tpu.memory_space<vmem>>, %arg6: memref<5x128x128xf32, #tpu.memory_space<vmem>>, %arg7: memref<5x128xf32, #tpu.memory_space<vmem>>, %arg8: memref<6x128xf32, #tpu.memory_space<vmem>>, %arg9: memref<6x128xf32, #tpu.memory_space<vmem>>, %arg10: memref<384x32xf32, #tpu.memory_space<vmem>>, %arg11: memref<1x32xf32, #tpu.memory_space<vmem>>, %arg12: memref<1x32xf32, #tpu.memory_space<vmem>>, %arg13: memref<1x32xf32, #tpu.memory_space<vmem>>, %arg14: memref<16x32xf32, #tpu.memory_space<vmem>>) attributes {dimension_semantics = [#tpu.dimension_semantics<parallel>], iteration_bounds = array<i64: 1>, scalar_prefetch = 0 : i64, scratch_operands = 0 : i64, tpu.core_type = #tpu.core_type<tc>, window_params = [{transform_indices = @transform_0, window_bounds = array<i64: 16, 128>}, {transform_indices = @transform_1, window_bounds = array<i64: 16, 128>}, {transform_indices = @transform_2, window_bounds = array<i64: 16, 32>}, {pipeline_mode = #tpu.pipeline_mode<synchronous>, transform_indices = @transform_3, window_bounds = array<i64: 128, 384>}, {pipeline_mode = #tpu.pipeline_mode<synchronous>, transform_indices = @transform_4, window_bounds = array<i64: 1, 384>}, {pipeline_mode = #tpu.pipeline_mode<synchronous>, transform_indices = @transform_5, window_bounds = array<i64: 5, 128, 128>}, {pipeline_mode = #tpu.pipeline_mode<synchronous>, transform_indices = @transform_6, window_bounds = array<i64: 5, 128>}, {pipeline_mode = #tpu.pipeline_mode<synchronous>, transform_indices = @transform_7, window_bounds = array<i64: 6, 128>}, {pipeline_mode = #tpu.pipeline_mode<synchronous>, transform_indices = @transform_8, window_bounds = array<i64: 6, 128>}, {pipeline_mode = #tpu.pipeline_mode<synchronous>, transform_indices = @transform_9, window_bounds = array<i64: 384, 32>}, {pipeline_mode = #tpu.pipeline_mode<synchronous>, transform_indices = @transform_10, window_bounds = array<i64: 1, 32>}, {pipeline_mode = #tpu.pipeline_mode<synchronous>, transform_indices = @transform_11, window_bounds = array<i64: 1, 32>}, {pipeline_mode = #tpu.pipeline_mode<synchronous>, transform_indices = @transform_12, window_bounds = array<i64: 1, 32>}, {transform_indices = @transform_13, window_bounds = array<i64: 16, 32>}]} {
    %0 = tpu.iota {dimensions = array<i32: 1>} : vector<1x128xi32>
    %c32_i32 = arith.constant 32 : i32
    %1 = vector.broadcast %c32_i32 : i32 to vector<1x128xi32>
    %2 = arith.cmpi slt, %0, %1 : vector<1x128xi32>
    %3 = arith.extui %2 : vector<1x128xi1> to vector<1x128xi32>
    %4 = arith.sitofp %3 : vector<1x128xi32> to vector<1x128xf32>
    %c0 = arith.constant 0 : index
    %c0_0 = arith.constant 0 : index
    %5 = vector.load %arg7[%c0, %c0_0] : memref<5x128xf32, #tpu.memory_space<vmem>>, vector<5x128xf32>
    %c0_1 = arith.constant 0 : index
    %c0_2 = arith.constant 0 : index
    %6 = vector.load %arg8[%c0_1, %c0_2] : memref<6x128xf32, #tpu.memory_space<vmem>>, vector<6x128xf32>
    %c0_3 = arith.constant 0 : index
    %c0_4 = arith.constant 0 : index
    %7 = vector.load %arg9[%c0_3, %c0_4] : memref<6x128xf32, #tpu.memory_space<vmem>>, vector<6x128xf32>
    %c0_5 = arith.constant 0 : index
    %c0_6 = arith.constant 0 : index
    %8 = vector.load %arg1[%c0_5, %c0_6] : memref<16x128xf32, #tpu.memory_space<vmem>>, vector<16x128xf32>
    %c0_7 = arith.constant 0 : index
    %c0_8 = arith.constant 0 : index
    %9 = vector.load %arg2[%c0_7, %c0_8] : memref<16x128xf32, #tpu.memory_space<vmem>>, vector<16x128xf32>
    %10 = arith.addf %8, %9 : vector<16x128xf32>
    %c0_9 = arith.constant 0 : index
    %c0_10 = arith.constant 0 : index
    %11 = vector.load %arg4[%c0_9, %c0_10] : memref<128x384xf32, #tpu.memory_space<vmem>>, vector<128x384xf32>
    %c0_11 = arith.constant 0 : index
    %c0_12 = arith.constant 0 : index
    %12 = vector.load %arg5[%c0_11, %c0_12] : memref<1x384xf32, #tpu.memory_space<vmem>>, vector<1x384xf32>
    %cst = arith.constant dense<0.000000e+00> : vector<16x384xf32>
    %13 = tpu.matmul %10, %11, %cst {dimension_numbers = #tpu.dot_dimension_numbers<[1], [0], [0], [1], [0, 0, 1, 1], [], []>} : vector<16x128xf32>, vector<128x384xf32>, vector<16x384xf32> -> vector<16x384xf32>
    %14 = vector.broadcast %12 : vector<1x384xf32> to vector<16x384xf32>
    %15 = arith.addf %13, %14 : vector<16x384xf32>
    %cst_13 = arith.constant 0.000000e+00 : f32
    %16 = vector.broadcast %cst_13 : f32 to vector<16x384xf32>
    %17 = arith.maximumf %15, %16 : vector<16x384xf32>
    %18 = vector.extract_strided_slice %17 {offsets = [0, 0], sizes = [16, 128], strides = [1, 1]} : vector<16x384xf32> to vector<16x128xf32>
    %19 = vector.extract_strided_slice %17 {offsets = [0, 128], sizes = [16, 128], strides = [1, 1]} : vector<16x384xf32> to vector<16x128xf32>
    %20 = vector.extract_strided_slice %17 {offsets = [0, 256], sizes = [16, 128], strides = [1, 1]} : vector<16x384xf32> to vector<16x128xf32>
    %c0_14 = arith.constant 0 : index
    %c0_15 = arith.constant 0 : index
    %c0_16 = arith.constant 0 : index
    %21 = vector.load %arg6[%c0_14, %c0_15, %c0_16] : memref<5x128x128xf32, #tpu.memory_space<vmem>>, vector<1x128x128xf32>
    %22 = vector.shape_cast %21 : vector<1x128x128xf32> to vector<128x128xf32>
    %23 = vector.extract_strided_slice %5 {offsets = [0, 0], sizes = [1, 128], strides = [1, 1]} : vector<5x128xf32> to vector<1x128xf32>
    %cst_17 = arith.constant dense<0.000000e+00> : vector<16x128xf32>
    %24 = tpu.matmul %18, %22, %cst_17 {dimension_numbers = #tpu.dot_dimension_numbers<[1], [0], [0], [1], [0, 0, 1, 1], [], []>} : vector<16x128xf32>, vector<128x128xf32>, vector<16x128xf32> -> vector<16x128xf32>
    %25 = vector.broadcast %23 : vector<1x128xf32> to vector<16x128xf32>
    %26 = arith.addf %24, %25 : vector<16x128xf32>
    %cst_18 = arith.constant 0.000000e+00 : f32
    %27 = vector.broadcast %cst_18 : f32 to vector<16x128xf32>
    %28 = arith.maximumf %26, %27 : vector<16x128xf32>
    %29 = vector.extract_strided_slice %6 {offsets = [0, 0], sizes = [1, 128], strides = [1, 1]} : vector<6x128xf32> to vector<1x128xf32>
    %30 = vector.extract_strided_slice %7 {offsets = [0, 0], sizes = [1, 128], strides = [1, 1]} : vector<6x128xf32> to vector<1x128xf32>
    %31 = vector.broadcast %4 : vector<1x128xf32> to vector<16x128xf32>
    %32 = arith.mulf %28, %31 : vector<16x128xf32>
    %cst_19 = arith.constant dense<0.000000e+00> : vector<16xf32>
    %33 = vector.multi_reduction <add>, %32, %cst_19 [1] : vector<16x128xf32> to vector<16xf32>
    %34 = vector.shape_cast %33 : vector<16xf32> to vector<16x1xf32>
    %cst_20 = arith.constant 3.125000e-02 : f32
    %35 = vector.broadcast %cst_20 : f32 to vector<16x1xf32>
    %36 = arith.mulf %34, %35 : vector<16x1xf32>
    %37 = vector.broadcast %36 : vector<16x1xf32> to vector<16x128xf32>
    %38 = arith.subf %28, %37 : vector<16x128xf32>
    %39 = vector.broadcast %4 : vector<1x128xf32> to vector<16x128xf32>
    %40 = arith.mulf %38, %39 : vector<16x128xf32>
    %41 = arith.mulf %40, %40 : vector<16x128xf32>
    %cst_21 = arith.constant dense<0.000000e+00> : vector<16xf32>
    %42 = vector.multi_reduction <add>, %41, %cst_21 [1] : vector<16x128xf32> to vector<16xf32>
    %43 = vector.shape_cast %42 : vector<16xf32> to vector<16x1xf32>
    %cst_22 = arith.constant 3.125000e-02 : f32
    %44 = vector.broadcast %cst_22 : f32 to vector<16x1xf32>
    %45 = arith.mulf %43, %44 : vector<16x1xf32>
    %cst_23 = arith.constant 9.99999974E-6 : f32
    %46 = vector.broadcast %cst_23 : f32 to vector<16x1xf32>
    %47 = arith.addf %45, %46 : vector<16x1xf32>
    %48 = math.rsqrt %47 : vector<16x1xf32>
    %49 = vector.broadcast %48 : vector<16x1xf32> to vector<16x128xf32>
    %50 = arith.mulf %40, %49 : vector<16x128xf32>
    %51 = vector.broadcast %29 : vector<1x128xf32> to vector<16x128xf32>
    %52 = arith.mulf %50, %51 : vector<16x128xf32>
    %53 = vector.broadcast %30 : vector<1x128xf32> to vector<16x128xf32>
    %54 = arith.addf %52, %53 : vector<16x128xf32>
    %c1 = arith.constant 1 : index
    %c0_24 = arith.constant 0 : index
    %c0_25 = arith.constant 0 : index
    %55 = vector.load %arg6[%c1, %c0_24, %c0_25] : memref<5x128x128xf32, #tpu.memory_space<vmem>>, vector<1x128x128xf32>
    %56 = vector.shape_cast %55 : vector<1x128x128xf32> to vector<128x128xf32>
    %57 = vector.extract_strided_slice %5 {offsets = [1, 0], sizes = [1, 128], strides = [1, 1]} : vector<5x128xf32> to vector<1x128xf32>
    %cst_26 = arith.constant dense<0.000000e+00> : vector<16x128xf32>
    %58 = tpu.matmul %54, %56, %cst_26 {dimension_numbers = #tpu.dot_dimension_numbers<[1], [0], [0], [1], [0, 0, 1, 1], [], []>} : vector<16x128xf32>, vector<128x128xf32>, vector<16x128xf32> -> vector<16x128xf32>
    %59 = vector.broadcast %57 : vector<1x128xf32> to vector<16x128xf32>
    %60 = arith.addf %58, %59 : vector<16x128xf32>
    %cst_27 = arith.constant 0.000000e+00 : f32
    %61 = vector.broadcast %cst_27 : f32 to vector<16x128xf32>
    %62 = arith.maximumf %60, %61 : vector<16x128xf32>
    %c2 = arith.constant 2 : index
    %c0_28 = arith.constant 0 : index
    %c0_29 = arith.constant 0 : index
    %63 = vector.load %arg6[%c2, %c0_28, %c0_29] : memref<5x128x128xf32, #tpu.memory_space<vmem>>, vector<1x128x128xf32>
    %64 = vector.shape_cast %63 : vector<1x128x128xf32> to vector<128x128xf32>
    %65 = vector.extract_strided_slice %5 {offsets = [2, 0], sizes = [1, 128], strides = [1, 1]} : vector<5x128xf32> to vector<1x128xf32>
    %cst_30 = arith.constant dense<0.000000e+00> : vector<16x128xf32>
    %66 = tpu.matmul %62, %64, %cst_30 {dimension_numbers = #tpu.dot_dimension_numbers<[1], [0], [0], [1], [0, 0, 1, 1], [], []>} : vector<16x128xf32>, vector<128x128xf32>, vector<16x128xf32> -> vector<16x128xf32>
    %67 = vector.broadcast %65 : vector<1x128xf32> to vector<16x128xf32>
    %68 = arith.addf %66, %67 : vector<16x128xf32>
    %cst_31 = arith.constant 0.000000e+00 : f32
    %69 = vector.broadcast %cst_31 : f32 to vector<16x128xf32>
    %70 = arith.maximumf %68, %69 : vector<16x128xf32>
    %71 = vector.extract_strided_slice %6 {offsets = [1, 0], sizes = [1, 128], strides = [1, 1]} : vector<6x128xf32> to vector<1x128xf32>
    %72 = vector.extract_strided_slice %7 {offsets = [1, 0], sizes = [1, 128], strides = [1, 1]} : vector<6x128xf32> to vector<1x128xf32>
    %73 = vector.broadcast %4 : vector<1x128xf32> to vector<16x128xf32>
    %74 = arith.mulf %70, %73 : vector<16x128xf32>
    %cst_32 = arith.constant dense<0.000000e+00> : vector<16xf32>
    %75 = vector.multi_reduction <add>, %74, %cst_32 [1] : vector<16x128xf32> to vector<16xf32>
    %76 = vector.shape_cast %75 : vector<16xf32> to vector<16x1xf32>
    %cst_33 = arith.constant 3.125000e-02 : f32
    %77 = vector.broadcast %cst_33 : f32 to vector<16x1xf32>
    %78 = arith.mulf %76, %77 : vector<16x1xf32>
    %79 = vector.broadcast %78 : vector<16x1xf32> to vector<16x128xf32>
    %80 = arith.subf %70, %79 : vector<16x128xf32>
    %81 = vector.broadcast %4 : vector<1x128xf32> to vector<16x128xf32>
    %82 = arith.mulf %80, %81 : vector<16x128xf32>
    %83 = arith.mulf %82, %82 : vector<16x128xf32>
    %cst_34 = arith.constant dense<0.000000e+00> : vector<16xf32>
    %84 = vector.multi_reduction <add>, %83, %cst_34 [1] : vector<16x128xf32> to vector<16xf32>
    %85 = vector.shape_cast %84 : vector<16xf32> to vector<16x1xf32>
    %cst_35 = arith.constant 3.125000e-02 : f32
    %86 = vector.broadcast %cst_35 : f32 to vector<16x1xf32>
    %87 = arith.mulf %85, %86 : vector<16x1xf32>
    %cst_36 = arith.constant 9.99999974E-6 : f32
    %88 = vector.broadcast %cst_36 : f32 to vector<16x1xf32>
    %89 = arith.addf %87, %88 : vector<16x1xf32>
    %90 = math.rsqrt %89 : vector<16x1xf32>
    %91 = vector.broadcast %90 : vector<16x1xf32> to vector<16x128xf32>
    %92 = arith.mulf %82, %91 : vector<16x128xf32>
    %93 = vector.broadcast %71 : vector<1x128xf32> to vector<16x128xf32>
    %94 = arith.mulf %92, %93 : vector<16x128xf32>
    %95 = vector.broadcast %72 : vector<1x128xf32> to vector<16x128xf32>
    %96 = arith.addf %94, %95 : vector<16x128xf32>
    %97 = vector.extract_strided_slice %6 {offsets = [2, 0], sizes = [1, 128], strides = [1, 1]} : vector<6x128xf32> to vector<1x128xf32>
    %98 = vector.extract_strided_slice %7 {offsets = [2, 0], sizes = [1, 128], strides = [1, 1]} : vector<6x128xf32> to vector<1x128xf32>
    %99 = vector.broadcast %4 : vector<1x128xf32> to vector<16x128xf32>
    %100 = arith.mulf %19, %99 : vector<16x128xf32>
    %cst_37 = arith.constant dense<0.000000e+00> : vector<16xf32>
    %101 = vector.multi_reduction <add>, %100, %cst_37 [1] : vector<16x128xf32> to vector<16xf32>
    %102 = vector.shape_cast %101 : vector<16xf32> to vector<16x1xf32>
    %cst_38 = arith.constant 3.125000e-02 : f32
    %103 = vector.broadcast %cst_38 : f32 to vector<16x1xf32>
    %104 = arith.mulf %102, %103 : vector<16x1xf32>
    %105 = vector.broadcast %104 : vector<16x1xf32> to vector<16x128xf32>
    %106 = arith.subf %19, %105 : vector<16x128xf32>
    %107 = vector.broadcast %4 : vector<1x128xf32> to vector<16x128xf32>
    %108 = arith.mulf %106, %107 : vector<16x128xf32>
    %109 = arith.mulf %108, %108 : vector<16x128xf32>
    %cst_39 = arith.constant dense<0.000000e+00> : vector<16xf32>
    %110 = vector.multi_reduction <add>, %109, %cst_39 [1] : vector<16x128xf32> to vector<16xf32>
    %111 = vector.shape_cast %110 : vector<16xf32> to vector<16x1xf32>
    %cst_40 = arith.constant 3.125000e-02 : f32
    %112 = vector.broadcast %cst_40 : f32 to vector<16x1xf32>
    %113 = arith.mulf %111, %112 : vector<16x1xf32>
    %cst_41 = arith.constant 9.99999974E-6 : f32
    %114 = vector.broadcast %cst_41 : f32 to vector<16x1xf32>
    %115 = arith.addf %113, %114 : vector<16x1xf32>
    %116 = math.rsqrt %115 : vector<16x1xf32>
    %117 = vector.broadcast %116 : vector<16x1xf32> to vector<16x128xf32>
    %118 = arith.mulf %108, %117 : vector<16x128xf32>
    %119 = vector.broadcast %97 : vector<1x128xf32> to vector<16x128xf32>
    %120 = arith.mulf %118, %119 : vector<16x128xf32>
    %121 = vector.broadcast %98 : vector<1x128xf32> to vector<16x128xf32>
    %122 = arith.addf %120, %121 : vector<16x128xf32>
    %c3 = arith.constant 3 : index
    %c0_42 = arith.constant 0 : index
    %c0_43 = arith.constant 0 : index
    %123 = vector.load %arg6[%c3, %c0_42, %c0_43] : memref<5x128x128xf32, #tpu.memory_space<vmem>>, vector<1x128x128xf32>
    %124 = vector.shape_cast %123 : vector<1x128x128xf32> to vector<128x128xf32>
    %125 = vector.extract_strided_slice %5 {offsets = [3, 0], sizes = [1, 128], strides = [1, 1]} : vector<5x128xf32> to vector<1x128xf32>
    %cst_44 = arith.constant dense<0.000000e+00> : vector<16x128xf32>
    %126 = tpu.matmul %122, %124, %cst_44 {dimension_numbers = #tpu.dot_dimension_numbers<[1], [0], [0], [1], [0, 0, 1, 1], [], []>} : vector<16x128xf32>, vector<128x128xf32>, vector<16x128xf32> -> vector<16x128xf32>
    %127 = vector.broadcast %125 : vector<1x128xf32> to vector<16x128xf32>
    %128 = arith.addf %126, %127 : vector<16x128xf32>
    %cst_45 = arith.constant 0.000000e+00 : f32
    %129 = vector.broadcast %cst_45 : f32 to vector<16x128xf32>
    %130 = arith.maximumf %128, %129 : vector<16x128xf32>
    %131 = vector.extract_strided_slice %6 {offsets = [3, 0], sizes = [1, 128], strides = [1, 1]} : vector<6x128xf32> to vector<1x128xf32>
    %132 = vector.extract_strided_slice %7 {offsets = [3, 0], sizes = [1, 128], strides = [1, 1]} : vector<6x128xf32> to vector<1x128xf32>
    %133 = vector.broadcast %4 : vector<1x128xf32> to vector<16x128xf32>
    %134 = arith.mulf %130, %133 : vector<16x128xf32>
    %cst_46 = arith.constant dense<0.000000e+00> : vector<16xf32>
    %135 = vector.multi_reduction <add>, %134, %cst_46 [1] : vector<16x128xf32> to vector<16xf32>
    %136 = vector.shape_cast %135 : vector<16xf32> to vector<16x1xf32>
    %cst_47 = arith.constant 3.125000e-02 : f32
    %137 = vector.broadcast %cst_47 : f32 to vector<16x1xf32>
    %138 = arith.mulf %136, %137 : vector<16x1xf32>
    %139 = vector.broadcast %138 : vector<16x1xf32> to vector<16x128xf32>
    %140 = arith.subf %130, %139 : vector<16x128xf32>
    %141 = vector.broadcast %4 : vector<1x128xf32> to vector<16x128xf32>
    %142 = arith.mulf %140, %141 : vector<16x128xf32>
    %143 = arith.mulf %142, %142 : vector<16x128xf32>
    %cst_48 = arith.constant dense<0.000000e+00> : vector<16xf32>
    %144 = vector.multi_reduction <add>, %143, %cst_48 [1] : vector<16x128xf32> to vector<16xf32>
    %145 = vector.shape_cast %144 : vector<16xf32> to vector<16x1xf32>
    %cst_49 = arith.constant 3.125000e-02 : f32
    %146 = vector.broadcast %cst_49 : f32 to vector<16x1xf32>
    %147 = arith.mulf %145, %146 : vector<16x1xf32>
    %cst_50 = arith.constant 9.99999974E-6 : f32
    %148 = vector.broadcast %cst_50 : f32 to vector<16x1xf32>
    %149 = arith.addf %147, %148 : vector<16x1xf32>
    %150 = math.rsqrt %149 : vector<16x1xf32>
    %151 = vector.broadcast %150 : vector<16x1xf32> to vector<16x128xf32>
    %152 = arith.mulf %142, %151 : vector<16x128xf32>
    %153 = vector.broadcast %131 : vector<1x128xf32> to vector<16x128xf32>
    %154 = arith.mulf %152, %153 : vector<16x128xf32>
    %155 = vector.broadcast %132 : vector<1x128xf32> to vector<16x128xf32>
    %156 = arith.addf %154, %155 : vector<16x128xf32>
    %157 = vector.extract_strided_slice %6 {offsets = [4, 0], sizes = [1, 128], strides = [1, 1]} : vector<6x128xf32> to vector<1x128xf32>
    %158 = vector.extract_strided_slice %7 {offsets = [4, 0], sizes = [1, 128], strides = [1, 1]} : vector<6x128xf32> to vector<1x128xf32>
    %159 = vector.broadcast %4 : vector<1x128xf32> to vector<16x128xf32>
    %160 = arith.mulf %20, %159 : vector<16x128xf32>
    %cst_51 = arith.constant dense<0.000000e+00> : vector<16xf32>
    %161 = vector.multi_reduction <add>, %160, %cst_51 [1] : vector<16x128xf32> to vector<16xf32>
    %162 = vector.shape_cast %161 : vector<16xf32> to vector<16x1xf32>
    %cst_52 = arith.constant 3.125000e-02 : f32
    %163 = vector.broadcast %cst_52 : f32 to vector<16x1xf32>
    %164 = arith.mulf %162, %163 : vector<16x1xf32>
    %165 = vector.broadcast %164 : vector<16x1xf32> to vector<16x128xf32>
    %166 = arith.subf %20, %165 : vector<16x128xf32>
    %167 = vector.broadcast %4 : vector<1x128xf32> to vector<16x128xf32>
    %168 = arith.mulf %166, %167 : vector<16x128xf32>
    %169 = arith.mulf %168, %168 : vector<16x128xf32>
    %cst_53 = arith.constant dense<0.000000e+00> : vector<16xf32>
    %170 = vector.multi_reduction <add>, %169, %cst_53 [1] : vector<16x128xf32> to vector<16xf32>
    %171 = vector.shape_cast %170 : vector<16xf32> to vector<16x1xf32>
    %cst_54 = arith.constant 3.125000e-02 : f32
    %172 = vector.broadcast %cst_54 : f32 to vector<16x1xf32>
    %173 = arith.mulf %171, %172 : vector<16x1xf32>
    %cst_55 = arith.constant 9.99999974E-6 : f32
    %174 = vector.broadcast %cst_55 : f32 to vector<16x1xf32>
    %175 = arith.addf %173, %174 : vector<16x1xf32>
    %176 = math.rsqrt %175 : vector<16x1xf32>
    %177 = vector.broadcast %176 : vector<16x1xf32> to vector<16x128xf32>
    %178 = arith.mulf %168, %177 : vector<16x128xf32>
    %179 = vector.broadcast %157 : vector<1x128xf32> to vector<16x128xf32>
    %180 = arith.mulf %178, %179 : vector<16x128xf32>
    %181 = vector.broadcast %158 : vector<1x128xf32> to vector<16x128xf32>
    %182 = arith.addf %180, %181 : vector<16x128xf32>
    %c4 = arith.constant 4 : index
    %c0_56 = arith.constant 0 : index
    %c0_57 = arith.constant 0 : index
    %183 = vector.load %arg6[%c4, %c0_56, %c0_57] : memref<5x128x128xf32, #tpu.memory_space<vmem>>, vector<1x128x128xf32>
    %184 = vector.shape_cast %183 : vector<1x128x128xf32> to vector<128x128xf32>
    %185 = vector.extract_strided_slice %5 {offsets = [4, 0], sizes = [1, 128], strides = [1, 1]} : vector<5x128xf32> to vector<1x128xf32>
    %cst_58 = arith.constant dense<0.000000e+00> : vector<16x128xf32>
    %186 = tpu.matmul %182, %184, %cst_58 {dimension_numbers = #tpu.dot_dimension_numbers<[1], [0], [0], [1], [0, 0, 1, 1], [], []>} : vector<16x128xf32>, vector<128x128xf32>, vector<16x128xf32> -> vector<16x128xf32>
    %187 = vector.broadcast %185 : vector<1x128xf32> to vector<16x128xf32>
    %188 = arith.addf %186, %187 : vector<16x128xf32>
    %cst_59 = arith.constant 0.000000e+00 : f32
    %189 = vector.broadcast %cst_59 : f32 to vector<16x128xf32>
    %190 = arith.maximumf %188, %189 : vector<16x128xf32>
    %191 = vector.extract_strided_slice %6 {offsets = [5, 0], sizes = [1, 128], strides = [1, 1]} : vector<6x128xf32> to vector<1x128xf32>
    %192 = vector.extract_strided_slice %7 {offsets = [5, 0], sizes = [1, 128], strides = [1, 1]} : vector<6x128xf32> to vector<1x128xf32>
    %193 = vector.broadcast %4 : vector<1x128xf32> to vector<16x128xf32>
    %194 = arith.mulf %190, %193 : vector<16x128xf32>
    %cst_60 = arith.constant dense<0.000000e+00> : vector<16xf32>
    %195 = vector.multi_reduction <add>, %194, %cst_60 [1] : vector<16x128xf32> to vector<16xf32>
    %196 = vector.shape_cast %195 : vector<16xf32> to vector<16x1xf32>
    %cst_61 = arith.constant 3.125000e-02 : f32
    %197 = vector.broadcast %cst_61 : f32 to vector<16x1xf32>
    %198 = arith.mulf %196, %197 : vector<16x1xf32>
    %199 = vector.broadcast %198 : vector<16x1xf32> to vector<16x128xf32>
    %200 = arith.subf %190, %199 : vector<16x128xf32>
    %201 = vector.broadcast %4 : vector<1x128xf32> to vector<16x128xf32>
    %202 = arith.mulf %200, %201 : vector<16x128xf32>
    %203 = arith.mulf %202, %202 : vector<16x128xf32>
    %cst_62 = arith.constant dense<0.000000e+00> : vector<16xf32>
    %204 = vector.multi_reduction <add>, %203, %cst_62 [1] : vector<16x128xf32> to vector<16xf32>
    %205 = vector.shape_cast %204 : vector<16xf32> to vector<16x1xf32>
    %cst_63 = arith.constant 3.125000e-02 : f32
    %206 = vector.broadcast %cst_63 : f32 to vector<16x1xf32>
    %207 = arith.mulf %205, %206 : vector<16x1xf32>
    %cst_64 = arith.constant 9.99999974E-6 : f32
    %208 = vector.broadcast %cst_64 : f32 to vector<16x1xf32>
    %209 = arith.addf %207, %208 : vector<16x1xf32>
    %210 = math.rsqrt %209 : vector<16x1xf32>
    %211 = vector.broadcast %210 : vector<16x1xf32> to vector<16x128xf32>
    %212 = arith.mulf %202, %211 : vector<16x128xf32>
    %213 = vector.broadcast %191 : vector<1x128xf32> to vector<16x128xf32>
    %214 = arith.mulf %212, %213 : vector<16x128xf32>
    %215 = vector.broadcast %192 : vector<1x128xf32> to vector<16x128xf32>
    %216 = arith.addf %214, %215 : vector<16x128xf32>
    %217 = tpu.concatenate %96, %156, %216 in 1 : vector<16x128xf32>, vector<16x128xf32>, vector<16x128xf32> -> vector<16x384xf32>
    %c0_65 = arith.constant 0 : index
    %c0_66 = arith.constant 0 : index
    %218 = vector.load %arg10[%c0_65, %c0_66] : memref<384x32xf32, #tpu.memory_space<vmem>>, vector<384x32xf32>
    %c0_67 = arith.constant 0 : index
    %c0_68 = arith.constant 0 : index
    %219 = vector.load %arg11[%c0_67, %c0_68] : memref<1x32xf32, #tpu.memory_space<vmem>>, vector<1x32xf32>
    %cst_69 = arith.constant dense<0.000000e+00> : vector<16x32xf32>
    %220 = tpu.matmul %217, %218, %cst_69 {dimension_numbers = #tpu.dot_dimension_numbers<[1], [0], [0], [1], [0, 0, 1, 1], [], []>} : vector<16x384xf32>, vector<384x32xf32>, vector<16x32xf32> -> vector<16x32xf32>
    %221 = vector.broadcast %219 : vector<1x32xf32> to vector<16x32xf32>
    %222 = arith.addf %220, %221 : vector<16x32xf32>
    %c0_70 = arith.constant 0 : index
    %c0_71 = arith.constant 0 : index
    %223 = vector.load %arg3[%c0_70, %c0_71] : memref<16x32xf32, #tpu.memory_space<vmem>>, vector<16x32xf32>
    %224 = tpu.iota {dimensions = array<i32: 1>} : vector<1x32xi32>
    %c6_i32 = arith.constant 6 : i32
    %225 = vector.broadcast %c6_i32 : i32 to vector<1x32xi32>
    %226 = arith.cmpi sle, %224, %225 : vector<1x32xi32>
    %c9_i32 = arith.constant 9 : i32
    %227 = vector.broadcast %c9_i32 : i32 to vector<1x32xi32>
    %228 = arith.cmpi sge, %224, %227 : vector<1x32xi32>
    %c11_i32 = arith.constant 11 : i32
    %229 = vector.broadcast %c11_i32 : i32 to vector<1x32xi32>
    %230 = arith.cmpi sle, %224, %229 : vector<1x32xi32>
    %231 = arith.andi %228, %230 : vector<1x32xi1>
    %232 = arith.ori %226, %231 : vector<1x32xi1>
    %233 = arith.addf %223, %222 : vector<16x32xf32>
    %234 = vector.shape_cast %232 : vector<1x32xi1> to vector<1x32xi1>
    %235 = vector.broadcast %234 : vector<1x32xi1> to vector<16x32xi1>
    %236 = arith.select %235, %233, %222 : vector<16x32xi1>, vector<16x32xf32>
    %c0_72 = arith.constant 0 : index
    %c0_73 = arith.constant 0 : index
    %237 = vector.load %arg12[%c0_72, %c0_73] : memref<1x32xf32, #tpu.memory_space<vmem>>, vector<1x32xf32>
    %238 = vector.broadcast %237 : vector<1x32xf32> to vector<16x32xf32>
    %239 = arith.maximumf %236, %238 : vector<16x32xf32>
    %c0_74 = arith.constant 0 : index
    %c0_75 = arith.constant 0 : index
    %240 = vector.load %arg13[%c0_74, %c0_75] : memref<1x32xf32, #tpu.memory_space<vmem>>, vector<1x32xf32>
    %241 = vector.broadcast %240 : vector<1x32xf32> to vector<16x32xf32>
    %242 = arith.minimumf %239, %241 : vector<16x32xf32>
    %c0_76 = arith.constant 0 : index
    %c0_77 = arith.constant 0 : index
    %243 = vector.load %arg14[%c0_76, %c0_77] : memref<16x32xf32, #tpu.memory_space<vmem>>, vector<16x32xf32>
    tpu.vector_store %arg14[%c0_76, %c0_77], %242 {strides = array<i32>} : memref<16x32xf32, #tpu.memory_space<vmem>>, vector<16x32xf32>,
    return
  }
  func.func @transform_0(%arg0: i32) -> (i32, i32) {
    %c0_i32 = arith.constant 0 : i32
    %c0_i32_0 = arith.constant 0 : i32
    return %arg0, %c0_i32 : i32, i32
  }
  func.func @transform_1(%arg0: i32) -> (i32, i32) {
    %c0_i32 = arith.constant 0 : i32
    %c0_i32_0 = arith.constant 0 : i32
    return %arg0, %c0_i32 : i32, i32
  }
  func.func @transform_2(%arg0: i32) -> (i32, i32) {
    %c0_i32 = arith.constant 0 : i32
    %c0_i32_0 = arith.constant 0 : i32
    return %arg0, %c0_i32 : i32, i32
  }
  func.func @transform_3(%arg0: i32) -> (i32, i32) {
    %c0_i32 = arith.constant 0 : i32
    %c0_i32_0 = arith.constant 0 : i32
    %c0_i32_1 = arith.constant 0 : i32
    return %c0_i32, %c0_i32_0 : i32, i32
  }
  func.func @transform_4(%arg0: i32) -> (i32, i32) {
    %c0_i32 = arith.constant 0 : i32
    %c0_i32_0 = arith.constant 0 : i32
    %c0_i32_1 = arith.constant 0 : i32
    return %c0_i32, %c0_i32_0 : i32, i32
  }
  func.func @transform_5(%arg0: i32) -> (i32, i32, i32) {
    %c0_i32 = arith.constant 0 : i32
    %c0_i32_0 = arith.constant 0 : i32
    %c0_i32_1 = arith.constant 0 : i32
    %c0_i32_2 = arith.constant 0 : i32
    return %c0_i32, %c0_i32_0, %c0_i32_1 : i32, i32, i32
  }
  func.func @transform_6(%arg0: i32) -> (i32, i32) {
    %c0_i32 = arith.constant 0 : i32
    %c0_i32_0 = arith.constant 0 : i32
    %c0_i32_1 = arith.constant 0 : i32
    return %c0_i32, %c0_i32_0 : i32, i32
  }
  func.func @transform_7(%arg0: i32) -> (i32, i32) {
    %c0_i32 = arith.constant 0 : i32
    %c0_i32_0 = arith.constant 0 : i32
    %c0_i32_1 = arith.constant 0 : i32
    return %c0_i32, %c0_i32_0 : i32, i32
  }
  func.func @transform_8(%arg0: i32) -> (i32, i32) {
    %c0_i32 = arith.constant 0 : i32
    %c0_i32_0 = arith.constant 0 : i32
    %c0_i32_1 = arith.constant 0 : i32
    return %c0_i32, %c0_i32_0 : i32, i32
  }
  func.func @transform_9(%arg0: i32) -> (i32, i32) {
    %c0_i32 = arith.constant 0 : i32
    %c0_i32_0 = arith.constant 0 : i32
    %c0_i32_1 = arith.constant 0 : i32
    return %c0_i32, %c0_i32_0 : i32, i32
  }
  func.func @transform_10(%arg0: i32) -> (i32, i32) {
    %c0_i32 = arith.constant 0 : i32
    %c0_i32_0 = arith.constant 0 : i32
    %c0_i32_1 = arith.constant 0 : i32
    return %c0_i32, %c0_i32_0 : i32, i32
  }
  func.func @transform_11(%arg0: i32) -> (i32, i32) {
    %c0_i32 = arith.constant 0 : i32
    %c0_i32_0 = arith.constant 0 : i32
    %c0_i32_1 = arith.constant 0 : i32
    return %c0_i32, %c0_i32_0 : i32, i32
  }
  func.func @transform_12(%arg0: i32) -> (i32, i32) {
    %c0_i32 = arith.constant 0 : i32
    %c0_i32_0 = arith.constant 0 : i32
    %c0_i32_1 = arith.constant 0 : i32
    return %c0_i32, %c0_i32_0 : i32, i32
  }
  func.func @transform_13(%arg0: i32) -> (i32, i32) {
    %c0_i32 = arith.constant 0 : i32
    %c0_i32_0 = arith.constant 0 : i32
    return %arg0, %c0_i32 : i32, i32
  }
}

</mosaic_0001>

<bundles_post_ra>
// kernel: trajectory_refiner_forward.1
= control target key start
LH: loop header
LB: loop body
LE: loop exit
PB: predicated region body
PF: predicated region fallthrough
CT: control target
= control target key end

     0   :  { %s1842_s3 = inlined_call_operand.vmem [shape: f32[128,384], index: 3, kind: input, shape index: {}]   ;;  %s1843_s5 = inlined_call_operand.vmem [shape: f32[5,128,128], index: 5, kind: input, shape index: {}]   ;;  %s1844_s0 = inlined_call_operand.vmem [shape: f32[16,128], index: 0, kind: input, shape index: {}]   ;;  %s1845_s1 = inlined_call_operand.vmem [shape: f32[16,128], index: 1, kind: input, shape index: {}]   ;;  %s1846_s4 = inlined_call_operand.vmem [shape: f32[1,384], index: 4, kind: input, shape index: {}]   ;;  %s1847_s6 = inlined_call_operand.vmem [shape: f32[5,128], index: 6, kind: input, shape index: {}]   ;;  %s1848_s7 = inlined_call_operand.vmem [shape: f32[6,128], index: 7, kind: input, shape index: {}]   ;;  %s1849_s8 = inlined_call_operand.vmem [shape: f32[6,128], index: 8, kind: input, shape index: {}]   ;;  %s1850_s9 = inlined_call_operand.vmem [shape: f32[384,32], index: 9, kind: input, shape index: {}]   ;;  %s1851_s10 = inlined_call_operand.vmem [shape: f32[1,32], index: 10, kind: input, shape index: {}]   ;;  %s1852_s11 = inlined_call_operand.vmem [shape: f32[1,32], index: 11, kind: input, shape index: {}]   ;;  %s1853_s12 = inlined_call_operand.vmem [shape: f32[1,32], index: 12, kind: input, shape index: {}]   ;;  %s1854_s2 = inlined_call_operand.vmem [shape: f32[16,32], index: 2, kind: input, shape index: {}]   ;;  %s1855_s13 = inlined_call_operand.vmem [shape: f32[16,32], index: 13, kind: output, shape index: {}]  }
   0x1   :  { %v103_v0 = vld [vmem:[%s1842_s3 + $0x168] sm:$0xff]  ;;  %v105_v1 = vld [vmem:[%s1842_s3 + $0x178] sm:$0xff]  ;;  %v100_v2 = vld [vmem:[%s1842_s3 + $0x150] sm:$0xff] }
   0x2   :  { %114 = vmatpush.msra.mxu0 %v103_v0  ;;  %160 = vmatpush.msra.mxu2 %v105_v1  ;;  %v102_v3 = vld [vmem:[%s1842_s3 + $0x160] sm:$0xff]  ;;  %v97_v4 = vld [vmem:[%s1842_s3 + $0x138] sm:$0xff]  ;;  %v99_v5 = vld [vmem:[%s1842_s3 + $0x148] sm:$0xff] }
   0x3   :  { %v94_v6 = vld [vmem:[%s1842_s3 + $0x120] sm:$0xff]  ;;  %v96_v7 = vld [vmem:[%s1842_s3 + $0x130] sm:$0xff]  ;;  %v91_v8 = vld [vmem:[%s1842_s3 + $0x108] sm:$0xff] }
   0x4   :  { %115 = vmatpush.msra.mxu0 %v100_v2  ;;  %161 = vmatpush.msra.mxu2 %v102_v3  ;;  %v93_v9 = vld [vmem:[%s1842_s3 + $0x118] sm:$0xff]  ;;  %v88_v10 = vld [vmem:[%s1842_s3 + $0xf0] sm:$0xff]  ;;  %v90_v11 = vld [vmem:[%s1842_s3 + $0x100] sm:$0xff] }
   0x5   :  { %v85_v12 = vld [vmem:[%s1842_s3 + $0xd8] sm:$0xff]  ;;  %v87_v13 = vld [vmem:[%s1842_s3 + $0xe8] sm:$0xff]  ;;  %v104_v14 = vld [vmem:[%s1842_s3 + $0x170] sm:$0xff] }
   0x6   :  { %116 = vmatpush.msra.mxu0 %v97_v4  ;;  %162 = vmatpush.msra.mxu2 %v99_v5  ;;  %v101_v15 = vld [vmem:[%s1842_s3 + $0x158] sm:$0xff]  ;;  %v82_v16 = vld [vmem:[%s1842_s3 + $0xc0] sm:$0xff]  ;;  %v84_v17 = vld [vmem:[%s1842_s3 + $0xd0] sm:$0xff] }
   0x7   :  { %137 = vmatpush.msra.mxu1 %v104_v14  ;;  %v98_v18 = vld [vmem:[%s1842_s3 + $0x140] sm:$0xff]  ;;  %v79_v19 = vld [vmem:[%s1842_s3 + $0xa8] sm:$0xff]  ;;  %v81_v20 = vld [vmem:[%s1842_s3 + $0xb8] sm:$0xff] }
   0x8   :  { %117 = vmatpush.msra.mxu0 %v94_v6  ;;  %163 = vmatpush.msra.mxu2 %v96_v7  ;;  %v95_v21 = vld [vmem:[%s1842_s3 + $0x128] sm:$0xff]  ;;  %v76_v22 = vld [vmem:[%s1842_s3 + $0x90] sm:$0xff]  ;;  %v78_v23 = vld [vmem:[%s1842_s3 + $0xa0] sm:$0xff] }
   0x9   :  { %138 = vmatpush.msra.mxu1 %v101_v15  ;;  %v92_v24 = vld [vmem:[%s1842_s3 + $0x110] sm:$0xff]  ;;  %v204_v25 = vld [vmem:[%s1843_s5 + $0x78] sm:$0xff]  ;;  %v75_v28 = vld [vmem:[%s1842_s3 + $0x88] sm:$0xff] }
   0xa   :  { %118 = vmatpush.msra.mxu0 %v91_v8  ;;  %164 = vmatpush.msra.mxu2 %v93_v9  ;;  %v203_v26 = vld [vmem:[%s1843_s5 + $0x70] sm:$0xff]  ;;  %v73_v27 = vld [vmem:[%s1842_s3 + $0x78] sm:$0xff]  ;;  %v202_v30 = vld [vmem:[%s1843_s5 + $0x68] sm:$0xff]  ;;  %v44_v8 = vlaneseq }
   0xb   :  { %139 = vmatpush.msra.mxu1 %v98_v18  ;;  %206 = vmatpush.msra.mxu3 %v204_v25  ;;  %v89_v29 = vld [vmem:[%s1842_s3 + $0xf8] sm:$0xff]  ;;  %v70_v31 = vld [vmem:[%s1842_s3 + $0x60] sm:$0xff]  ;;  %v72_v32 = vld [vmem:[%s1842_s3 + $0x70] sm:$0xff] }
   0xc   :  { %119 = vmatpush.msra.mxu0 %v88_v10  ;;  %165 = vmatpush.msra.mxu2 %v90_v11  ;;  %v86_v33 = vld [vmem:[%s1842_s3 + $0xe0] sm:$0xff]  ;;  %v67_v35 = vld [vmem:[%s1842_s3 + $0x48] sm:$0xff]  ;;  %v69_v36 = vld [vmem:[%s1842_s3 + $0x58] sm:$0xff]  ;;  %v1246_v11 = vand.u32 127, %v44_v8 }
   0xd   :  { %140 = vmatpush.msra.mxu1 %v95_v21  ;;  %207 = vmatpush.msra.mxu3 %v203_v26  ;;  %v201_v34 = vld [vmem:[%s1843_s5 + $0x60] sm:$0xff]  ;;  %v83_v37 = vld [vmem:[%s1842_s3 + $0xc8] sm:$0xff]  ;;  %v200_v38 = vld [vmem:[%s1843_s5 + $0x58] sm:$0xff] }
   0xe   :  { %120 = vmatpush.msra.mxu0 %v85_v12  ;;  %166 = vmatpush.msra.mxu2 %v87_v13  ;;  %v64_v39 = vld [vmem:[%s1842_s3 + $0x30] sm:$0xff]  ;;  %v66_v40 = vld [vmem:[%s1842_s3 + $0x40] sm:$0xff]  ;;  %v61_v45 = vld [vmem:[%s1842_s3 + $0x18] sm:$0xff]  ;;  %vm46_vm0 = vcmp.lt.s32.totalorder %v1246_v11, 32 }
   0xf   :  { %141 = vmatpush.msra.mxu1 %v92_v24  ;;  %208 = vmatpush.msra.mxu3 %v202_v30  ;;  %v52_v41 = vld [vmem:[%s1844_s0] sm:$0xff]  ;;  %v80_v43 = vld [vmem:[%s1842_s3 + $0xb0] sm:$0xff]  ;;  %v63_v46 = vld [vmem:[%s1842_s3 + $0x28] sm:$0xff] }
  0x10   :  { %121 = vmatpush.msra.mxu0 %v82_v16  ;;  %167 = vmatpush.msra.mxu2 %v84_v17  ;;  %v54_v42 = vld [vmem:[%s1845_s1] sm:$0xff]  ;;  %v199_v44 = vld [vmem:[%s1843_s5 + $0x50] sm:$0xff]  ;;  %v77_v47 = vld [vmem:[%s1842_s3 + $0x98] sm:$0xff]  ;;  %v965_v17 = vmov 0.0  }
  0x11   :  { %142 = vmatpush.msra.mxu1 %v89_v29  ;;  %209 = vmatpush.msra.mxu3 %v201_v34  ;;  %v198_v48 = vld [vmem:[%s1843_s5 + $0x48] sm:$0xff]  ;;  %v58_v49 = vld [vmem:[%s1842_s3] sm:$0xff]  ;;  %v60_v50 = vld [vmem:[%s1842_s3 + $0x10] sm:$0xff]  ;;  %v56_v51 = vadd.f32 %v54_v42, %v52_v41  ;;  %v1250_v18 = vsel %vm46_vm0, 1.0, %v965_v17 }
  0x12   :  { %122 = vmatpush.msra.mxu0 %v79_v19  ;;  %168 = vmatpush.msra.mxu2 %v81_v20  ;;  %v74_v52 = vld [vmem:[%s1842_s3 + $0x80] sm:$0xff]  ;;  %v71_v54 = vld [vmem:[%s1842_s3 + $0x68] sm:$0xff]  ;;  %v196_v55 = vld [vmem:[%s1843_s5 + $0x38] sm:$0xff] }
  0x13   :  { %143 = vmatpush.msra.mxu1 %v86_v33  ;;  %210 = vmatpush.msra.mxu3 %v200_v38  ;;  %v197_v53 = vld [vmem:[%s1843_s5 + $0x40] sm:$0xff]  ;;  %v53_v56 = vld [vmem:[%s1844_s0 + $0x8] sm:$0xff]  ;;  %v68_v58 = vld [vmem:[%s1842_s3 + $0x50] sm:$0xff] }
  0x14   :  { %123 = vmatpush.msra.mxu0 %v76_v22  ;;  %169 = vmatpush.msra.mxu2 %v78_v23  ;;  %v55_v57 = vld [vmem:[%s1845_s1 + $0x8] sm:$0xff]  ;;  %v195_v59 = vld [vmem:[%s1843_s5 + $0x30] sm:$0xff]  ;;  %v65_v61 = vld [vmem:[%s1842_s3 + $0x38] sm:$0xff] }
  0x15   :  { %144 = vmatpush.msra.mxu1 %v83_v37  ;;  %211 = vmatpush.msra.mxu3 %v199_v44  ;;  %v57_v60 = vadd.f32 %v55_v57, %v53_v56  ;;  %v194_v62 = vld [vmem:[%s1843_s5 + $0x28] sm:$0xff]  ;;  %v62_v63 = vld [vmem:[%s1842_s3 + $0x20] sm:$0xff]  ;;  %v192_v2 = vld [vmem:[%s1843_s5 + $0x18] sm:$0xff] }
  0x16   :  { %124 = vmatpush.msra.mxu0 %v73_v27  ;;  %170 = vmatpush.msra.mxu2 %v75_v28  ;;  %v193_v0 = vld [vmem:[%s1843_s5 + $0x20] sm:$0xff]  ;;  %v59_v1 = vld [vmem:[%s1842_s3 + $0x8] sm:$0xff]  ;;  %v191_v3 = vld [vmem:[%s1843_s5 + $0x10] sm:$0xff] }
  0x17   :  { %145 = vmatpush.msra.mxu1 %v80_v43  ;;  %212 = vmatpush.msra.mxu3 %v198_v48  ;;  %v190_v4 = vld [vmem:[%s1843_s5 + $0x8] sm:$0xff]  ;;  %v189_v5 = vld [vmem:[%s1843_s5] sm:$0xff]  ;;  %v916_v56 = vld [vmem:[%s1843_s5 + $0x258] sm:$0xff] }
  0x18   :  { %125 = vmatpush.msra.mxu0 %v70_v31  ;;  %171 = vmatpush.msra.mxu2 %v72_v32  ;;  %v1243_v6 = vld [vmem:[%s1846_s4] sm:$0x7]  ;;  %v915_v57 = vld [vmem:[%s1843_s5 + $0x250] sm:$0xff]  ;;  %v898_v17 = vld [vmem:[%s1843_s5 + $0x1c8] sm:$0xff] }
  0x19   :  { %146 = vmatpush.msra.mxu1 %v77_v47  ;;  %213 = vmatpush.msra.mxu3 %v197_v53  ;;  %v108_v7 = vperm.slane %v1243_v6, 0  ;;  %v110_v13 = vperm.slane %v1243_v6, 2  ;;  %v109_v21 = vperm.slane %v1243_v6, 1  ;;  %v1260_v30 = vld [vmem:[%s1847_s6] sm:$0x1f] }
  0x1a   :  { %126 = vmatpush.msra.mxu0 %v67_v35  ;;  %172 = vmatpush.msra.mxu2 %v69_v36  ;;  %v205_v32 = vperm.slane %v1260_v30, 0  ;;  %v920_v35 = vld [vmem:[%s1843_s5 + $0x278] sm:$0xff]  ;;  %v919_v36 = vld [vmem:[%s1843_s5 + $0x270] sm:$0xff] }
  0x1b   :  { %147 = vmatpush.msra.mxu1 %v74_v52  ;;  %214 = vmatpush.msra.mxu3 %v196_v55  ;;  %v917_v55 = vld [vmem:[%s1843_s5 + $0x260] sm:$0xff] }
  0x1c   :  { %127 = vmatpush.msra.mxu0 %v64_v39  ;;  %173 = vmatpush.msra.mxu2 %v66_v40 }
  0x1d   :  { %148 = vmatpush.msra.mxu1 %v71_v54  ;;  %215 = vmatpush.msra.mxu3 %v195_v59  ;;  %v918_v54 = vld [vmem:[%s1843_s5 + $0x268] sm:$0xff]  ;;  %v913_v59 = vld [vmem:[%s1843_s5 + $0x240] sm:$0xff] }
  0x1e   :  { %128 = vmatpush.msra.mxu0 %v61_v45  ;;  %174 = vmatpush.msra.mxu2 %v63_v46 }
  0x1f   :  { %149 = vmatpush.msra.mxu1 %v68_v58  ;;  %216 = vmatpush.msra.mxu3 %v194_v62  ;;  %v914_v58 = vld [vmem:[%s1843_s5 + $0x248] sm:$0xff] }
  0x20   :  { %129 = vmatpush.msra.mxu0 %v58_v49  ;;  %175 = vmatpush.msra.mxu2 %v60_v50  ;;  %v910_v62 = vld [vmem:[%s1843_s5 + $0x228] sm:$0xff] }
  0x21   :  { %130 = vmatmul.f32.vlgmr.msra.gmra.mxu0 %v56_v51  ;;  %176 = vmatmul.f32.vlgmr.msra.gmra.mxu2 %v56_v51 }
  0x22   :  { %150 = vmatpush.msra.mxu1 %v65_v61  ;;  %217 = vmatpush.msra.mxu3 %v193_v0  ;;  %v911_v61 = vld [vmem:[%s1843_s5 + $0x230] sm:$0xff]  ;;  %v908_v0 = vld [vmem:[%s1843_s5 + $0x218] sm:$0xff] }
  0x24   :  { %151 = vmatpush.msra.mxu1 %v62_v63  ;;  %218 = vmatpush.msra.mxu3 %v192_v2  ;;  %v909_v63 = vld [vmem:[%s1843_s5 + $0x220] sm:$0xff]  ;;  %v906_v2 = vld [vmem:[%s1843_s5 + $0x208] sm:$0xff] }
  0x26   :  { %152 = vmatpush.msra.mxu1 %v59_v1  ;;  %219 = vmatpush.msra.mxu3 %v191_v3  ;;  %v907_v1 = vld [vmem:[%s1843_s5 + $0x210] sm:$0xff]  ;;  %v904_v3 = vld [vmem:[%s1843_s5 + $0x1f8] sm:$0xff] }
  0x27   :  { %153 = vmatmul.f32.vlgmr.msra.gmra.mxu1 %v56_v51  ;;  %485 = vmatpush.msrb.mxu2 %v904_v3 }
  0x28   :  { %220 = vmatpush.msra.mxu3 %v190_v4  ;;  %v905_v4 = vld [vmem:[%s1843_s5 + $0x200] sm:$0xff] }
  0x29   :  { %133 = vmatmul.f32.gmra.mxu0 %v57_v60  ;;  %179 = vmatmul.f32.gmra.mxu2 %v57_v60 }
  0x2a   :  { %221 = vmatpush.msra.mxu3 %v189_v5  ;;  %v903_v5 = vld [vmem:[%s1843_s5 + $0x1f0] sm:$0xff] }
  0x2b   :  { %486 = vmatpush.msrb.mxu2 %v903_v5 }
  0x2c   :  { %628 = vmatpush.msrb.mxu3 %v920_v35 }
  0x2e   :  { %629 = vmatpush.msrb.mxu3 %v919_v36 }
  0x2f   :  { %156 = vmatmul.f32.gmra.mxu1 %v57_v60  ;;  %v912_v60 = vld [vmem:[%s1843_s5 + $0x238] sm:$0xff] }
  0x30   :  { %630 = vmatpush.msrb.mxu3 %v918_v54 }
  0x32   :  { %631 = vmatpush.msrb.mxu3 %v917_v55 }
  0x34   :  { %632 = vmatpush.msrb.mxu3 %v916_v56  ;;  %v889_v56 = vld [vmem:[%s1843_s5 + $0x180] sm:$0xff] }
  0x36   :  { %633 = vmatpush.msrb.mxu3 %v915_v57 }
  0x38   :  { %634 = vmatpush.msrb.mxu3 %v914_v58 }
  0x3a   :  { %635 = vmatpush.msrb.mxu3 %v913_v59 }
  0x3c   :  { %636 = vmatpush.msrb.mxu3 %v912_v60 }
  0x3e   :  { %637 = vmatpush.msrb.mxu3 %v911_v61  ;;  %v871_v61 = vld [vmem:[%s1843_s5 + $0xf0] sm:$0xff] }
  0x40   :  { %638 = vmatpush.msrb.mxu3 %v910_v62 }
  0x42   :  { %639 = vmatpush.msrb.mxu3 %v909_v63 }
  0x44   :  { %640 = vmatpush.msrb.mxu3 %v908_v0 }
  0x46   :  { %641 = vmatpush.msrb.mxu3 %v907_v1 }
  0x48   :  { %642 = vmatpush.msrb.mxu3 %v906_v2 }
  0x4a   :  { %643 = vmatpush.msrb.mxu3 %v905_v4 }
  0x9e   :  { %v131_v9 = vpop.f32.mrf.mxu0 }
  0x9f   :  { %v132_v10 = vadd.f32 %v131_v9, %v108_v7 }
  0xa1   :  { %v183_v12 = vmax.f32 %v132_v10, 0.0  ;;  %v901_v10 = vld [vmem:[%s1843_s5 + $0x1e0] sm:$0xff] }
  0xa3   :  { %222 = vmatmul.f32.vlgmr.msra.gmra.mxu3 %v183_v12 }
  0xa4   :  { %v177_v14 = vpop.f32.mrf.mxu2  ;;  %v154_v24 = vpop.f32.mrf.mxu1 }
  0xa5   :  { %v178_v15 = vadd.f32 %v177_v14, %v110_v13  ;;  %v155_v25 = vadd.f32 %v154_v24, %v109_v21  ;;  %v899_v14 = vld [vmem:[%s1843_s5 + $0x1d0] sm:$0xff]  ;;  %v896_v24 = vld [vmem:[%s1843_s5 + $0x1b8] sm:$0xff] }
  0xa6   :  { %v134_v16 = vpop.f32.mrf.mxu0 }
  0xa7   :  { %v185_v19 = vmax.f32 %v178_v15, 0.0  ;;  %v135_v20 = vadd.f32 %v134_v16, %v108_v7  ;;  %v184_v26 = vmax.f32 %v155_v25, 0.0  ;;  %v902_v7 = vld [vmem:[%s1843_s5 + $0x1e8] sm:$0xff] }
  0xa8   :  { %487 = vmatpush.msrb.mxu2 %v902_v7 }
  0xa9   :  { %v186_v22 = vmax.f32 %v135_v20, 0.0  ;;  %v560_v23 = vmul.f32 %v1250_v18, %v185_v19  ;;  %v417_v27 = vmul.f32 %v1250_v18, %v184_v26  ;;  %v897_v20 = vld [vmem:[%s1843_s5 + $0x1c0] sm:$0xff] }
  0xaa   :  { %488 = vmatpush.msrb.mxu2 %v901_v10 }
  0xab   :  { %562 = vadd.xlane.f32.xlu2 %v560_v23  ;;  %225 = vmatmul.f32.gmra.mxu3 %v186_v22 }
  0xac   :  { %v180_v42 = vpop.f32.mrf.mxu2  ;;  %v157_v35 = vpop.f32.mrf.mxu1 }
  0xad   :  { %v1283_v45 = vadd.f32 %v180_v42, %v110_v13  ;;  %v900_v13 = vld [vmem:[%s1843_s5 + $0x1d8] sm:$0xff]  ;;  %v1398_v42 = vadd.f32 %v157_v35, %v109_v21 }
  0xae   :  { %489 = vmatpush.msrb.mxu2 %v900_v13 }
  0xaf   :  { %v188_v48 = vmax.f32 %v1283_v45, 0.0 }
  0xb0   :  { %490 = vmatpush.msrb.mxu2 %v899_v14 }
  0xb1   :  { %v561_v51 = vmul.f32 %v1250_v18, %v188_v48 }
  0xb2   :  { %491 = vmatpush.msrb.mxu2 %v898_v17  ;;  %v869_v17 = vld [vmem:[%s1843_s5 + $0xe0] sm:$0xff] }
  0xb3   :  { %419 = vadd.xlane.f32.xlu2 %v417_v27  ;;  %v895_v27 = vld [vmem:[%s1843_s5 + $0x1b0] sm:$0xff] }
  0xb4   :  { %492 = vmatpush.msrb.mxu2 %v897_v20  ;;  %v866_v20 = vld [vmem:[%s1843_s5 + $0xc8] sm:$0xff] }
  0xb6   :  { %493 = vmatpush.msrb.mxu2 %v896_v24  ;;  %v864_v24 = vld [vmem:[%s1843_s5 + $0xb8] sm:$0xff] }
  0xb8   :  { %494 = vmatpush.msrb.mxu2 %v895_v27  ;;  %v861_v27 = vld [vmem:[%s1843_s5 + $0xa0] sm:$0xff] }
 0x11e   :  { %v563_v28 = vpop.xlane.xlu2 %562 }
 0x11f   :  { %v566_v29 = vmul.f32 0.03125, %v563_v28 }
 0x121   :  { %v568_v31 = vsub.f32 %v185_v19, %v566_v29 }
 0x123   :  { %v1264_v33 = vmul.f32 %v1250_v18, %v568_v31 }
 0x125   :  { %v572_v34 = vmul.f32 %v1264_v33, %v1264_v33 }
 0x126   :  { %v223_v37 = vpop.f32.mrf.mxu3  ;;  %v420_v46 = vpop.xlane.xlu2 %419 }
 0x127   :  { %v1274_v38 = vadd.f32 %v223_v37, %v205_v32  ;;  %574 = vadd.xlane.f32.xlu2 %v572_v34  ;;  %v423_v49 = vmul.f32 0.03125, %v420_v46  ;;  %v893_v37 = vld [vmem:[%s1843_s5 + $0x1a0] sm:$0xff] }
 0x128   :  { %v1406_v46 = vld [vmem:[%s1849_s8] sm:$0x3f] }
 0x129   :  { %v229_v39 = vmax.f32 %v1274_v38, 0.0  ;;  %v425_v50 = vsub.f32 %v184_v26, %v423_v49  ;;  %v890_v49 = vld [vmem:[%s1843_s5 + $0x188] sm:$0xff]  ;;  %v607_v55 = vperm.slane %v1406_v46, 4  ;;  %v464_v13 = vperm.slane %v1406_v46, 2 }
 0x12b   :  { %v231_v40 = vmul.f32 %v1250_v18, %v229_v39  ;;  %v1293_v52 = vmul.f32 %v1250_v18, %v425_v50 }
 0x12d   :  { %233 = vadd.xlane.f32.xlu0 %v231_v40  ;;  %v429_v53 = vmul.f32 %v1293_v52, %v1293_v52 }
 0x12e   :  { %v226_v41 = vpop.f32.mrf.mxu3 }
 0x12f   :  { %v1280_v43 = vadd.f32 %v226_v41, %v205_v32  ;;  %v894_v32 = vld [vmem:[%s1843_s5 + $0x1a8] sm:$0xff] }
 0x130   :  { %495 = vmatpush.msrb.mxu2 %v894_v32  ;;  %v857_v32 = vld [vmem:[%s1843_s5 + $0x80] sm:$0xff] }
 0x131   :  { %v230_v44 = vmax.f32 %v1280_v43, 0.0  ;;  %v892_v43 = vld [vmem:[%s1843_s5 + $0x198] sm:$0xff] }
 0x132   :  { %496 = vmatpush.msrb.mxu2 %v893_v37 }
 0x133   :  { %v232_v47 = vmul.f32 %v1250_v18, %v230_v44 }
 0x134   :  { %497 = vmatpush.msrb.mxu2 %v892_v43 }
 0x135   :  { %235 = vadd.xlane.f32.xlu0 %v232_v47  ;;  %v891_v47 = vld [vmem:[%s1843_s5 + $0x190] sm:$0xff] }
 0x136   :  { %498 = vmatpush.msrb.mxu2 %v891_v47 }
 0x138   :  { %499 = vmatpush.msrb.mxu2 %v890_v49 }
 0x13a   :  { %500 = vmatpush.msrb.mxu2 %v889_v56 }
 0x13d   :  { %564 = vadd.xlane.f32.xlu0 %v561_v51 }
 0x145   :  { %431 = vadd.xlane.f32.xlu0 %v429_v53  ;;  %v187_v53 = vmax.f32 %v1398_v42, 0.0 }
 0x147   :  { %v418_v60 = vmul.f32 %v1250_v18, %v187_v53 }
 0x19a   :  { %v575_v8 = vpop.xlane.xlu2 %574 }
 0x19b   :  { %v578_v9 = vmul.f32 0.03125, %v575_v8 }
 0x19d   :  { %v580_v12 = vadd.f32 1e-05, %v578_v9 }
 0x19f   :  { %941 = vrsqrt.f32 %v580_v12  ;;  %vm588_vm1 = vweird.f32 %v580_v12 }
 0x1a0   :  { %v234_v15 = vpop.xlane.xlu0 %233 }
 0x1a1   :  { %v237_v16 = vmul.f32 0.03125, %v234_v15 }
 0x1a3   :  { %v239_v19 = vsub.f32 %v229_v39, %v237_v16  ;;  %v1387_v39 = vld [vmem:[%s1848_s7] sm:$0x3f]  ;;  %v870_v16 = vld [vmem:[%s1843_s5 + $0xe8] sm:$0xff] }
 0x1a4   :  { %v604_v21 = vperm.slane %v1387_v39, 4  ;;  %v461_v9 = vperm.slane %v1387_v39, 2 }
 0x1a5   :  { %v942_v22 = vpop.eup %941  ;;  %v1366_v23 = vmul.f32 %v1250_v18, %v239_v19  ;;  %v867_v19 = vld [vmem:[%s1843_s5 + $0xd0] sm:$0xff] }
 0x1a6   :  { %v583_v25 = vmul.f32 %v942_v22, %v580_v12  ;;  %vm589_vm2 = vweird.f32 %v942_v22 }
 0x1a7   :  { %v243_v26 = vmul.f32 %v1366_v23, %v1366_v23  ;;  %vm1389_vm3 = vmor %vm588_vm1, %vm589_vm2 }
 0x1a8   :  { %v584_v28 = vmul.f32 %v942_v22, %v583_v25  ;;  %v236_v29 = vpop.xlane.xlu0 %235  ;;  %v863_v25 = vld [vmem:[%s1843_s5 + $0xb0] sm:$0xff] }
 0x1a9   :  { %v238_v31 = vmul.f32 0.03125, %v236_v29  ;;  %245 = vadd.xlane.f32.xlu1 %v243_v26  ;;  %v862_v26 = vld [vmem:[%s1843_s5 + $0xa8] sm:$0xff]  ;;  %v859_v29 = vld [vmem:[%s1843_s5 + $0x90] sm:$0xff] }
 0x1aa   :  { %v585_v34 = vmul.f32 0.5, %v584_v28  ;;  %v860_v28 = vld [vmem:[%s1843_s5 + $0x98] sm:$0xff] }
 0x1ab   :  { %v240_v36 = vsub.f32 %v230_v44, %v238_v31  ;;  %v858_v31 = vld [vmem:[%s1843_s5 + $0x88] sm:$0xff] }
 0x1ac   :  { %v586_v38 = vsub.f32 1.5, %v585_v34 }
 0x1ad   :  { %v1394_v41 = vmul.f32 %v1250_v18, %v240_v36 }
 0x1ae   :  { %v587_v44 = vmul.f32 %v942_v22, %v586_v38 }
 0x1af   :  { %v244_v6 = vmul.f32 %v1394_v41, %v1394_v41 }
 0x1b0   :  { %v591_v50 = vsel %vm1389_vm3, %v942_v22, %v587_v44  ;;  %v565_v51 = vpop.xlane.xlu0 %564  ;;  %v865_v22 = vld [vmem:[%s1843_s5 + $0xc0] sm:$0xff] }
 0x1b1   :  { %247 = vadd.xlane.f32.xlu1 %v244_v6  ;;  %v602_v54 = vmul.f32 %v591_v50, %v1264_v33  ;;  %v567_v57 = vmul.f32 0.03125, %v565_v51  ;;  %v872_v33 = vld [vmem:[%s1843_s5 + $0xf8] sm:$0xff] }
 0x1b2   :  { %299 = vmatpush.msrb.mxu0 %v872_v33 }
 0x1b3   :  { %v605_v58 = vmul.f32 %v604_v21, %v602_v54  ;;  %v569_v62 = vsub.f32 %v188_v48, %v567_v57 }
 0x1b4   :  { %300 = vmatpush.msrb.mxu0 %v871_v61 }
 0x1b5   :  { %v608_v59 = vadd.f32 %v607_v55, %v605_v58  ;;  %v1441_v2 = vmul.f32 %v1250_v18, %v569_v62 }
 0x1b6   :  { %301 = vmatpush.msrb.mxu0 %v870_v16 }
 0x1b7   :  { %644 = vmatmul.f32.vlgmr.msrb.gmra.mxu3 %v608_v59  ;;  %v573_v3 = vmul.f32 %v1441_v2, %v1441_v2 }
 0x1b8   :  { %v432_v63 = vpop.xlane.xlu0 %431  ;;  %302 = vmatpush.msrb.mxu0 %v869_v17 }
 0x1b9   :  { %v435_v0 = vmul.f32 0.03125, %v432_v63  ;;  %421 = vadd.xlane.f32.xlu1 %v418_v60  ;;  %v275_v60 = vperm.slane %v1387_v39, 0 }
 0x1bb   :  { %v437_v1 = vadd.f32 1e-05, %v435_v0  ;;  %v278_v0 = vperm.slane %v1406_v46, 0 }
 0x1bd   :  { %943 = vrsqrt.f32 %v437_v1  ;;  %vm445_vm4 = vweird.f32 %v437_v1 }
 0x1c1   :  { %576 = vadd.xlane.f32.xlu1 %v573_v3 }
 0x1c3   :  { %v944_v4 = vpop.eup %943 }
 0x1c4   :  { %v440_v5 = vmul.f32 %v944_v4, %v437_v1  ;;  %vm446_vm5 = vweird.f32 %v944_v4 }
 0x1c5   :  { %vm447_vm6 = vmor %vm445_vm4, %vm446_vm5 }
 0x1c6   :  { %v441_v7 = vmul.f32 %v944_v4, %v440_v5 }
 0x1c8   :  { %v442_v8 = vmul.f32 0.5, %v441_v7 }
 0x1ca   :  { %v443_v45 = vsub.f32 1.5, %v442_v8  ;;  %v627_v8 = vperm.slane %v1260_v30, 4 }
 0x1cc   :  { %v444_v48 = vmul.f32 %v944_v4, %v443_v45 }
 0x1ce   :  { %v448_v10 = vsel %vm447_vm6, %v944_v4, %v444_v48 }
 0x1cf   :  { %v459_v12 = vmul.f32 %v448_v10, %v1293_v52  ;;  %v868_v52 = vld [vmem:[%s1843_s5 + $0xd8] sm:$0xff] }
 0x1d0   :  { %303 = vmatpush.msrb.mxu0 %v868_v52 }
 0x1d1   :  { %v462_v14 = vmul.f32 %v461_v9, %v459_v12 }
 0x1d2   :  { %304 = vmatpush.msrb.mxu0 %v867_v19  ;;  %v888_v19 = vld [vmem:[%s1843_s5 + $0x178] sm:$0xff] }
 0x1d3   :  { %v465_v15 = vadd.f32 %v464_v13, %v462_v14  ;;  %342 = vmatpush.msrb.mxu1 %v888_v19 }
 0x1d4   :  { %305 = vmatpush.msrb.mxu0 %v866_v20  ;;  %v887_v20 = vld [vmem:[%s1843_s5 + $0x170] sm:$0xff] }
 0x1d5   :  { %501 = vmatmul.f32.vlgmr.msrb.gmra.mxu2 %v465_v15  ;;  %343 = vmatpush.msrb.mxu1 %v887_v20 }
 0x1d6   :  { %306 = vmatpush.msrb.mxu0 %v865_v22 }
 0x1d8   :  { %307 = vmatpush.msrb.mxu0 %v864_v24 }
 0x1da   :  { %308 = vmatpush.msrb.mxu0 %v863_v25  ;;  %v885_v25 = vld [vmem:[%s1843_s5 + $0x160] sm:$0xff] }
 0x1dc   :  { %309 = vmatpush.msrb.mxu0 %v862_v26 }
 0x1de   :  { %310 = vmatpush.msrb.mxu0 %v861_v27  ;;  %v884_v27 = vld [vmem:[%s1843_s5 + $0x158] sm:$0xff] }
 0x1e0   :  { %311 = vmatpush.msrb.mxu0 %v860_v28 }
 0x1e2   :  { %312 = vmatpush.msrb.mxu0 %v859_v29  ;;  %v883_v29 = vld [vmem:[%s1843_s5 + $0x150] sm:$0xff] }
 0x1e4   :  { %313 = vmatpush.msrb.mxu0 %v858_v31 }
 0x1e6   :  { %314 = vmatpush.msrb.mxu0 %v857_v32  ;;  %v882_v32 = vld [vmem:[%s1843_s5 + $0x148] sm:$0xff] }
 0x21c   :  { %v246_v34 = vpop.xlane.xlu1 %245 }
 0x21d   :  { %v249_v35 = vmul.f32 0.03125, %v246_v34 }
 0x21f   :  { %v251_v36 = vadd.f32 1e-05, %v249_v35 }
 0x221   :  { %945 = vrsqrt.f32 %v251_v36  ;;  %vm259_vm8 = vweird.f32 %v251_v36 }
 0x224   :  { %v248_v37 = vpop.xlane.xlu1 %247 }
 0x225   :  { %v250_v38 = vmul.f32 0.03125, %v248_v37 }
 0x227   :  { %v946_v40 = vpop.eup %945  ;;  %v252_v43 = vadd.f32 1e-05, %v250_v38  ;;  %v484_v38 = vperm.slane %v1260_v30, 3 }
 0x228   :  { %v254_v44 = vmul.f32 %v946_v40, %v251_v36  ;;  %vm260_vm7 = vweird.f32 %v946_v40 }
 0x229   :  { %947 = vrsqrt.f32 %v252_v43  ;;  %vm261_vm9 = vmor %vm259_vm8, %vm260_vm7  ;;  %vm269_vm11 = vweird.f32 %v252_v43 }
 0x22a   :  { %v255_v47 = vmul.f32 %v946_v40, %v254_v44 }
 0x22c   :  { %v256_v6 = vmul.f32 0.5, %v255_v47  ;;  %v422_v49 = vpop.xlane.xlu1 %421  ;;  %v879_v47 = vld [vmem:[%s1843_s5 + $0x130] sm:$0xff] }
 0x22d   :  { %v424_v50 = vmul.f32 0.03125, %v422_v49  ;;  %v877_v49 = vld [vmem:[%s1843_s5 + $0x120] sm:$0xff] }
 0x22e   :  { %v257_v51 = vsub.f32 1.5, %v256_v6  ;;  %v878_v6 = vld [vmem:[%s1843_s5 + $0x128] sm:$0xff] }
 0x22f   :  { %v948_v54 = vpop.eup %947  ;;  %v426_v56 = vsub.f32 %v187_v53, %v424_v50  ;;  %v876_v50 = vld [vmem:[%s1843_s5 + $0x118] sm:$0xff] }
 0x230   :  { %v258_v57 = vmul.f32 %v946_v40, %v257_v51  ;;  %v264_v58 = vmul.f32 %v948_v54, %v252_v43  ;;  %vm270_vm10 = vweird.f32 %v948_v54  ;;  %v875_v51 = vld [vmem:[%s1843_s5 + $0x110] sm:$0xff] }
 0x231   :  { %v1497_v59 = vmul.f32 %v1250_v18, %v426_v56  ;;  %vm271_vm12 = vmor %vm269_vm11, %vm270_vm10  ;;  %v873_v56 = vld [vmem:[%s1843_s5 + $0x100] sm:$0xff] }
 0x232   :  { %v262_v33 = vsel %vm261_vm9, %v946_v40, %v258_v57  ;;  %v265_v61 = vmul.f32 %v948_v54, %v264_v58 }
 0x233   :  { %v430_v62 = vmul.f32 %v1497_v59, %v1497_v59  ;;  %v273_v63 = vmul.f32 %v262_v33, %v1366_v23 }
 0x234   :  { %v266_v42 = vmul.f32 0.5, %v265_v61  ;;  %v577_v53 = vpop.xlane.xlu1 %576  ;;  %v298_v61 = vperm.slane %v1260_v30, 1 }
 0x235   :  { %v579_v1 = vmul.f32 0.03125, %v577_v53  ;;  %433 = vadd.xlane.f32.xlu2 %v430_v62  ;;  %v276_v3 = vmul.f32 %v275_v60, %v273_v63 }
 0x236   :  { %v267_v4 = vsub.f32 1.5, %v266_v42 }
 0x237   :  { %v581_v5 = vadd.f32 1e-05, %v579_v1  ;;  %v279_v7 = vadd.f32 %v278_v0, %v276_v3 }
 0x238   :  { %v268_v45 = vmul.f32 %v948_v54, %v267_v4 }
 0x239   :  { %949 = vrsqrt.f32 %v581_v5  ;;  %315 = vmatmul.f32.vlgmr.msrb.gmra.mxu0 %v279_v7  ;;  %vm598_vm14 = vweird.f32 %v581_v5 }
 0x23a   :  { %v645_v48 = vpop.f32.mrf.mxu3  ;;  %v272_v23 = vsel %vm271_vm12, %v948_v54, %v268_v45  ;;  %v874_v54 = vld [vmem:[%s1843_s5 + $0x108] sm:$0xff] }
 0x23b   :  { %v1507_v10 = vadd.f32 %v645_v48, %v627_v8  ;;  %v274_v12 = vmul.f32 %v272_v23, %v1394_v41  ;;  %v886_v41 = vld [vmem:[%s1843_s5 + $0x168] sm:$0xff] }
 0x23c   :  { %344 = vmatpush.msrb.mxu1 %v886_v41  ;;  %v750_v41 = vld [vmem:[%s1850_s9 + $0x178] sm:$0xff] }
 0x23d   :  { %v651_v14 = vmax.f32 %v1507_v10, 0.0  ;;  %v277_v15 = vmul.f32 %v275_v60, %v274_v12  ;;  %801 = vmatpush.msra.mxu2 %v750_v41  ;;  %v748_v10 = vld [vmem:[%s1850_s9 + $0x168] sm:$0xff] }
 0x23e   :  { %345 = vmatpush.msrb.mxu1 %v885_v25  ;;  %v746_v25 = vld [vmem:[%s1850_s9 + $0x158] sm:$0xff]  ;;  %v728_v41 = vld [vmem:[%s1850_s9 + $0xc8] sm:$0xff] }
 0x23f   :  { %v950_v16 = vpop.eup %949  ;;  %v653_v17 = vmul.f32 %v1250_v18, %v651_v14  ;;  %v280_v52 = vadd.f32 %v278_v0, %v277_v15 }
 0x240   :  { %v593_v22 = vmul.f32 %v950_v16, %v581_v5  ;;  %vm599_vm13 = vweird.f32 %v950_v16  ;;  %346 = vmatpush.msrb.mxu1 %v884_v27  ;;  %v341_v27 = vperm.slane %v1260_v30, 2 }
 0x241   :  { %655 = vadd.xlane.f32.xlu0 %v653_v17  ;;  %318 = vmatmul.f32.gmra.mxu0 %v280_v52  ;;  %vm600_vm15 = vmor %vm598_vm14, %vm599_vm13 }
 0x242   :  { %v594_v24 = vmul.f32 %v950_v16, %v593_v22  ;;  %347 = vmatpush.msrb.mxu1 %v883_v29 }
 0x244   :  { %v595_v26 = vmul.f32 0.5, %v594_v24  ;;  %348 = vmatpush.msrb.mxu1 %v882_v32  ;;  %v747_v24 = vld [vmem:[%s1850_s9 + $0x160] sm:$0xff] }
 0x245   :  { %v743_v32 = vld [vmem:[%s1850_s9 + $0x140] sm:$0xff] }
 0x246   :  { %v596_v28 = vsub.f32 1.5, %v595_v26  ;;  %v745_v26 = vld [vmem:[%s1850_s9 + $0x150] sm:$0xff] }
 0x248   :  { %v597_v31 = vmul.f32 %v950_v16, %v596_v28  ;;  %v744_v28 = vld [vmem:[%s1850_s9 + $0x148] sm:$0xff] }
 0x24a   :  { %v601_v34 = vsel %vm600_vm15, %v950_v16, %v597_v31 }
 0x24b   :  { %v603_v35 = vmul.f32 %v601_v34, %v1441_v2 }
 0x24d   :  { %v606_v36 = vmul.f32 %v604_v21, %v603_v35  ;;  %v881_v21 = vld [vmem:[%s1843_s5 + $0x140] sm:$0xff]  ;;  %v742_v35 = vld [vmem:[%s1850_s9 + $0x138] sm:$0xff] }
 0x24e   :  { %349 = vmatpush.msrb.mxu1 %v881_v21  ;;  %v740_v21 = vld [vmem:[%s1850_s9 + $0x128] sm:$0xff] }
 0x24f   :  { %v609_v37 = vadd.f32 %v607_v55, %v606_v36  ;;  %v880_v55 = vld [vmem:[%s1843_s5 + $0x138] sm:$0xff] }
 0x250   :  { %350 = vmatpush.msrb.mxu1 %v880_v55 }
 0x251   :  { %647 = vmatmul.f32.gmra.mxu3 %v609_v37 }
 0x252   :  { %351 = vmatpush.msrb.mxu1 %v879_v47 }
 0x254   :  { %352 = vmatpush.msrb.mxu1 %v878_v6 }
 0x256   :  { %353 = vmatpush.msrb.mxu1 %v877_v49 }
 0x258   :  { %v502_v40 = vpop.f32.mrf.mxu2  ;;  %354 = vmatpush.msrb.mxu1 %v876_v50  ;;  %v739_v50 = vld [vmem:[%s1850_s9 + $0x120] sm:$0xff] }
 0x259   :  { %v1543_v43 = vadd.f32 %v502_v40, %v484_v38  ;;  %v741_v40 = vld [vmem:[%s1850_s9 + $0x130] sm:$0xff] }
 0x25a   :  { %355 = vmatpush.msrb.mxu1 %v875_v51 }
 0x25b   :  { %v508_v44 = vmax.f32 %v1543_v43, 0.0 }
 0x25c   :  { %356 = vmatpush.msrb.mxu1 %v874_v54  ;;  %v738_v54 = vld [vmem:[%s1850_s9 + $0x118] sm:$0xff] }
 0x25d   :  { %v510_v2 = vmul.f32 %v1250_v18, %v508_v44 }
 0x25e   :  { %357 = vmatpush.msrb.mxu1 %v873_v56 }
 0x25f   :  { %512 = vadd.xlane.f32.xlu2 %v510_v2 }
 0x2a8   :  { %v434_v57 = vpop.xlane.xlu2 %433 }
 0x2a9   :  { %v436_v58 = vmul.f32 0.03125, %v434_v57  ;;  %v737_v57 = vld [vmem:[%s1850_s9 + $0x110] sm:$0xff] }
 0x2ab   :  { %v438_v60 = vadd.f32 1e-05, %v436_v58  ;;  %v736_v58 = vld [vmem:[%s1850_s9 + $0x108] sm:$0xff] }
 0x2ad   :  { %951 = vrsqrt.f32 %v438_v60  ;;  %vm455_vm1 = vweird.f32 %v438_v60 }
 0x2b3   :  { %v952_v33 = vpop.eup %951 }
 0x2b4   :  { %v450_v62 = vmul.f32 %v952_v33, %v438_v60  ;;  %vm456_vm0 = vweird.f32 %v952_v33  ;;  %v656_v16 = vpop.xlane.xlu0 %655 }
 0x2b5   :  { %vm457_vm2 = vmor %vm455_vm1, %vm456_vm0  ;;  %v659_v52 = vmul.f32 0.03125, %v656_v16  ;;  %v700_v16 = vperm.slane %v1406_v46, 5 }
 0x2b6   :  { %v451_v63 = vmul.f32 %v952_v33, %v450_v62  ;;  %v316_v0 = vpop.f32.mrf.mxu0 }
 0x2b7   :  { %v317_v42 = vadd.f32 %v316_v0, %v298_v61  ;;  %v661_v22 = vsub.f32 %v651_v14, %v659_v52 }
 0x2b8   :  { %v452_v53 = vmul.f32 0.5, %v451_v63 }
 0x2b9   :  { %v322_v1 = vmax.f32 %v317_v42, 0.0 }
 0x2ba   :  { %v453_v3 = vsub.f32 1.5, %v452_v53 }
 0x2bb   :  { %358 = vmatmul.f32.vlgmr.msrb.gmra.mxu1 %v322_v1 }
 0x2bc   :  { %v454_v4 = vmul.f32 %v952_v33, %v453_v3 }
 0x2be   :  { %v319_v5 = vpop.f32.mrf.mxu0  ;;  %v458_v7 = vsel %vm457_vm2, %v952_v33, %v454_v4 }
 0x2bf   :  { %v320_v45 = vadd.f32 %v319_v5, %v298_v61  ;;  %v460_v48 = vmul.f32 %v458_v7, %v1497_v59 }
 0x2c1   :  { %v323_v23 = vmax.f32 %v320_v45, 0.0  ;;  %v463_v12 = vmul.f32 %v461_v9, %v460_v48  ;;  %v1588_v9 = vmul.f32 %v1250_v18, %v661_v22  ;;  %v732_v22 = vld [vmem:[%s1850_s9 + $0xe8] sm:$0xff] }
 0x2c3   :  { %361 = vmatmul.f32.gmra.mxu1 %v323_v23  ;;  %v466_v15 = vadd.f32 %v464_v13, %v463_v12  ;;  %v665_v13 = vmul.f32 %v1588_v9, %v1588_v9  ;;  %v697_v23 = vperm.slane %v1387_v39, 5 }
 0x2c5   :  { %504 = vmatmul.f32.gmra.mxu2 %v466_v15 }
 0x2d2   :  { %v513_v2 = vpop.xlane.xlu2 %512 }
 0x2d3   :  { %v516_v47 = vmul.f32 0.03125, %v513_v2 }
 0x2d4   :  { %v648_v17 = vpop.f32.mrf.mxu3 }
 0x2d5   :  { %v649_v19 = vadd.f32 %v648_v17, %v627_v8  ;;  %v749_v8 = vld [vmem:[%s1850_s9 + $0x170] sm:$0xff]  ;;  %v518_v56 = vsub.f32 %v508_v44, %v516_v47  ;;  %v735_v44 = vld [vmem:[%s1850_s9 + $0x100] sm:$0xff] }
 0x2d6   :  { %802 = vmatpush.msra.mxu2 %v749_v8  ;;  %v727_v8 = vld [vmem:[%s1850_s9 + $0xc0] sm:$0xff] }
 0x2d7   :  { %v652_v20 = vmax.f32 %v649_v19, 0.0  ;;  %v1664_v61 = vmul.f32 %v1250_v18, %v518_v56  ;;  %v734_v19 = vld [vmem:[%s1850_s9 + $0xf8] sm:$0xff] }
 0x2d8   :  { %803 = vmatpush.msra.mxu2 %v748_v10  ;;  %778 = vmatpush.msra.mxu1 %v734_v19  ;;  %v726_v10 = vld [vmem:[%s1850_s9 + $0xb8] sm:$0xff] }
 0x2d9   :  { %v654_v59 = vmul.f32 %v1250_v18, %v652_v20  ;;  %v522_v63 = vmul.f32 %v1664_v61, %v1664_v61 }
 0x2da   :  { %804 = vmatpush.msra.mxu2 %v747_v24  ;;  %v725_v24 = vld [vmem:[%s1850_s9 + $0xb0] sm:$0xff] }
 0x2db   :  { %657 = vadd.xlane.f32.xlu0 %v654_v59  ;;  %v731_v59 = vld [vmem:[%s1850_s9 + $0xe0] sm:$0xff] }
 0x2dc   :  { %805 = vmatpush.msra.mxu2 %v746_v25 }
 0x2de   :  { %806 = vmatpush.msra.mxu2 %v745_v26  ;;  %v724_v26 = vld [vmem:[%s1850_s9 + $0xa8] sm:$0xff] }
 0x2e0   :  { %807 = vmatpush.msra.mxu2 %v744_v28  ;;  %v723_v28 = vld [vmem:[%s1850_s9 + $0xa0] sm:$0xff] }
 0x2e2   :  { %808 = vmatpush.msra.mxu2 %v743_v32  ;;  %v722_v32 = vld [vmem:[%s1850_s9 + $0x98] sm:$0xff] }
 0x2e3   :  { %667 = vadd.xlane.f32.xlu0 %v665_v13  ;;  %v729_v13 = vld [vmem:[%s1850_s9 + $0xd0] sm:$0xff] }
 0x2e4   :  { %809 = vmatpush.msra.mxu2 %v742_v35 }
 0x2e6   :  { %810 = vmatpush.msra.mxu2 %v741_v40  ;;  %v720_v40 = vld [vmem:[%s1850_s9 + $0x88] sm:$0xff] }
 0x2e8   :  { %811 = vmatpush.msra.mxu2 %v740_v21 }
 0x2ea   :  { %812 = vmatpush.msra.mxu2 %v739_v50 }
 0x2ec   :  { %813 = vmatpush.msra.mxu2 %v738_v54 }
 0x2ee   :  { %814 = vmatpush.msra.mxu2 %v737_v57 }
 0x2f0   :  { %815 = vmatpush.msra.mxu2 %v736_v58 }
 0x2f2   :  { %816 = vmatpush.msra.mxu2 %v735_v44  ;;  %v718_v44 = vld [vmem:[%s1850_s9 + $0x78] sm:$0xff] }
 0x2f3   :  { %921 = vmatpush.msra.mxu3 %v718_v44  ;;  %755 = vmatpush.msra.mxu0 %v718_v44 }
 0x338   :  { %v359_v14 = vpop.f32.mrf.mxu1 }
 0x339   :  { %v1623_v36 = vadd.f32 %v359_v14, %v341_v27 }
 0x33b   :  { %v365_v6 = vmax.f32 %v1623_v36, 0.0 }
 0x33d   :  { %v367_v30 = vmul.f32 %v1250_v18, %v365_v6 }
 0x340   :  { %v362_v29 = vpop.f32.mrf.mxu1 }
 0x341   :  { %v1614_v31 = vadd.f32 %v362_v29, %v341_v27 }
 0x343   :  { %v366_v34 = vmax.f32 %v1614_v31, 0.0  ;;  %v721_v31 = vld [vmem:[%s1850_s9 + $0x90] sm:$0xff] }
 0x345   :  { %v368_v37 = vmul.f32 %v1250_v18, %v366_v34 }
 0x347   :  { %371 = vadd.xlane.f32.xlu1 %v368_v37 }
 0x348   :  { %v505_v55 = vpop.f32.mrf.mxu2 }
 0x349   :  { %v1637_v49 = vadd.f32 %v505_v55, %v484_v38  ;;  %v719_v55 = vld [vmem:[%s1850_s9 + $0x80] sm:$0xff] }
 0x34b   :  { %v509_v51 = vmax.f32 %v1637_v49, 0.0 }
 0x34d   :  { %v511_v38 = vmul.f32 %v1250_v18, %v509_v51 }
 0x34e   :  { %v658_v60 = vpop.xlane.xlu0 %657 }
 0x34f   :  { %v660_v43 = vmul.f32 0.03125, %v658_v60  ;;  %369 = vadd.xlane.f32.xlu1 %v367_v30  ;;  %514 = vadd.xlane.f32.xlu2 %v511_v38 }
 0x351   :  { %v662_v33 = vsub.f32 %v652_v20, %v660_v43  ;;  %v733_v20 = vld [vmem:[%s1850_s9 + $0xf0] sm:$0xff] }
 0x352   :  { %779 = vmatpush.msra.mxu1 %v733_v20 }
 0x353   :  { %v1667_v62 = vmul.f32 %v1250_v18, %v662_v33  ;;  %v717_v33 = vld [vmem:[%s1850_s9 + $0x70] sm:$0xff] }
 0x354   :  { %780 = vmatpush.msra.mxu1 %v732_v22  ;;  %922 = vmatpush.msra.mxu3 %v717_v33 }
 0x355   :  { %v666_v0 = vmul.f32 %v1667_v62, %v1667_v62  ;;  %756 = vmatpush.msra.mxu0 %v717_v33  ;;  %v414_v33 = vperm.slane %v1406_v46, 1 }
 0x356   :  { %v668_v42 = vpop.xlane.xlu0 %667  ;;  %781 = vmatpush.msra.mxu1 %v731_v59 }
 0x357   :  { %v671_v53 = vmul.f32 0.03125, %v668_v42  ;;  %524 = vadd.xlane.f32.xlu2 %v522_v63  ;;  %669 = vadd.xlane.f32.xlu0 %v666_v0 }
 0x359   :  { %v673_v1 = vadd.f32 1e-05, %v671_v53 }
 0x35b   :  { %953 = vrsqrt.f32 %v673_v1  ;;  %vm681_vm4 = vweird.f32 %v673_v1 }
 0x361   :  { %v954_v3 = vpop.eup %953 }
 0x362   :  { %v676_v4 = vmul.f32 %v954_v3, %v673_v1  ;;  %vm682_vm3 = vweird.f32 %v954_v3 }
 0x363   :  { %vm683_vm5 = vmor %vm681_vm4, %vm682_vm3 }
 0x364   :  { %v677_v5 = vmul.f32 %v954_v3, %v676_v4 }
 0x366   :  { %v678_v7 = vmul.f32 0.5, %v677_v5 }
 0x368   :  { %v679_v45 = vsub.f32 1.5, %v678_v7 }
 0x36a   :  { %v680_v48 = vmul.f32 %v954_v3, %v679_v45  ;;  %v554_v45 = vperm.slane %v1387_v39, 3 }
 0x36c   :  { %v684_v12 = vsel %vm683_vm5, %v954_v3, %v680_v48  ;;  %vm827_vm5 = vcmp.ge.s32.totalorder %v1246_v11, 9 }
 0x36d   :  { %v695_v15 = vmul.f32 %v684_v12, %v1588_v9  ;;  %v730_v9 = vld [vmem:[%s1850_s9 + $0xd8] sm:$0xff] }
 0x36e   :  { %782 = vmatpush.msra.mxu1 %v730_v9  ;;  %v712_v9 = vld [vmem:[%s1850_s9 + $0x48] sm:$0xff] }
 0x36f   :  { %v698_v17 = vmul.f32 %v697_v23, %v695_v15  ;;  %v557_v15 = vperm.slane %v1406_v46, 3 }
 0x370   :  { %783 = vmatpush.msra.mxu1 %v729_v13  ;;  %v711_v13 = vld [vmem:[%s1850_s9 + $0x40] sm:$0xff] }
 0x371   :  { %v701_v52 = vadd.f32 %v700_v16, %v698_v17 }
 0x372   :  { %784 = vmatpush.msra.mxu1 %v728_v41  ;;  %v710_v41 = vld [vmem:[%s1850_s9 + $0x38] sm:$0xff] }
 0x373   :  { %817 = vmatmul.f32.vlgmr.msra.gmra.mxu2 %v701_v52 }
 0x374   :  { %785 = vmatpush.msra.mxu1 %v727_v8  ;;  %v709_v8 = vld [vmem:[%s1850_s9 + $0x30] sm:$0xff] }
 0x376   :  { %786 = vmatpush.msra.mxu1 %v726_v10  ;;  %v708_v10 = vld [vmem:[%s1850_s9 + $0x28] sm:$0xff] }
 0x378   :  { %787 = vmatpush.msra.mxu1 %v725_v24  ;;  %v706_v24 = vld [vmem:[%s1850_s9 + $0x18] sm:$0xff] }
 0x37a   :  { %788 = vmatpush.msra.mxu1 %v724_v26  ;;  %v704_v26 = vld [vmem:[%s1850_s9 + $0x8] sm:$0xff] }
 0x37c   :  { %789 = vmatpush.msra.mxu1 %v723_v28 }
 0x37e   :  { %790 = vmatpush.msra.mxu1 %v722_v32 }
 0x380   :  { %791 = vmatpush.msra.mxu1 %v721_v31 }
 0x382   :  { %792 = vmatpush.msra.mxu1 %v720_v40 }
 0x384   :  { %793 = vmatpush.msra.mxu1 %v719_v55 }
 0x3ba   :  { %v372_v14 = vpop.xlane.xlu1 %371 }
 0x3bb   :  { %v374_v25 = vmul.f32 0.03125, %v372_v14  ;;  %v707_v14 = vld [vmem:[%s1850_s9 + $0x20] sm:$0xff] }
 0x3bd   :  { %v376_v27 = vsub.f32 %v366_v34, %v374_v25  ;;  %v705_v25 = vld [vmem:[%s1850_s9 + $0x10] sm:$0xff] }
 0x3bf   :  { %v1719_v29 = vmul.f32 %v1250_v18, %v376_v27  ;;  %v703_v27 = vld [vmem:[%s1850_s9] sm:$0xff] }
 0x3c1   :  { %v380_v35 = vmul.f32 %v1719_v29, %v1719_v29 }
 0x3c2   :  { %v370_v34 = vpop.xlane.xlu1 %369  ;;  %v515_v37 = vpop.xlane.xlu2 %514 }
 0x3c3   :  { %v373_v2 = vmul.f32 0.03125, %v370_v34  ;;  %v517_v21 = vmul.f32 0.03125, %v515_v37  ;;  %383 = vadd.xlane.f32.xlu1 %v380_v35 }
 0x3c5   :  { %v375_v47 = vsub.f32 %v365_v6, %v373_v2  ;;  %v519_v50 = vsub.f32 %v509_v51, %v517_v21 }
 0x3c7   :  { %v1740_v54 = vmul.f32 %v1250_v18, %v375_v47  ;;  %v1743_v56 = vmul.f32 %v1250_v18, %v519_v50 }
 0x3c9   :  { %v379_v30 = vmul.f32 %v1740_v54, %v1740_v54  ;;  %v523_v38 = vmul.f32 %v1743_v56, %v1743_v56 }
 0x3ca   :  { %v525_v57 = vpop.xlane.xlu2 %524  ;;  %v670_v36 = vpop.xlane.xlu0 %669 }
 0x3cb   :  { %v528_v6 = vmul.f32 0.03125, %v525_v57  ;;  %v672_v58 = vmul.f32 0.03125, %v670_v36  ;;  %381 = vadd.xlane.f32.xlu1 %v379_v30  ;;  %526 = vadd.xlane.f32.xlu2 %v523_v38 }
 0x3cd   :  { %v530_v49 = vadd.f32 1e-05, %v528_v6  ;;  %v674_v51 = vadd.f32 1e-05, %v672_v58 }
 0x3cf   :  { %955 = vrsqrt.f32 %v530_v49  ;;  %vm538_vm8 = vweird.f32 %v530_v49  ;;  %vm691_vm10 = vweird.f32 %v674_v51 }
 0x3d0   :  { %957 = vrsqrt.f32 %v674_v51 }
 0x3d5   :  { %v956_v60 = vpop.eup %955 }
 0x3d6   :  { %v958_v18 = vpop.eup %957  ;;  %v533_v43 = vmul.f32 %v956_v60, %v530_v49  ;;  %vm539_vm6 = vweird.f32 %v956_v60 }
 0x3d7   :  { %v686_v63 = vmul.f32 %v958_v18, %v674_v51  ;;  %vm692_vm7 = vweird.f32 %v958_v18  ;;  %vm540_vm9 = vmor %vm538_vm8, %vm539_vm6  ;;  %v411_v51 = vperm.slane %v1387_v39, 1  ;;  %vm828_vm6 = vcmp.le.s32.totalorder %v1246_v11, 11 }
 0x3d8   :  { %v534_v0 = vmul.f32 %v956_v60, %v533_v43  ;;  %vm693_vm11 = vmor %vm691_vm10, %vm692_vm7  ;;  %vm826_vm7 = vcmp.le.s32.totalorder %v1246_v11, 6  ;;  %vm849_vm10 = vcmask 261120  }
 0x3d9   :  { %v687_v42 = vmul.f32 %v958_v18, %v686_v63  ;;  %vm829_vm8 = vmand %vm827_vm5, %vm828_vm6 }
 0x3da   :  { %v535_v53 = vmul.f32 0.5, %v534_v0 }
 0x3db   :  { %v688_v1 = vmul.f32 0.5, %v687_v42 }
 0x3dc   :  { %v536_v3 = vsub.f32 1.5, %v535_v53 }
 0x3dd   :  { %v689_v4 = vsub.f32 1.5, %v688_v1 }
 0x3de   :  { %v537_v5 = vmul.f32 %v956_v60, %v536_v3 }
 0x3df   :  { %v690_v7 = vmul.f32 %v958_v18, %v689_v4 }
 0x3e0   :  { %v541_v48 = vsel %vm540_vm9, %v956_v60, %v537_v5  ;;  %vm830_vm9 = vmor %vm826_vm7, %vm829_vm8 }
 0x3e1   :  { %v552_v12 = vmul.f32 %v541_v48, %v1664_v61  ;;  %v694_v17 = vsel %vm693_vm11, %v958_v18, %v690_v7  ;;  %v716_v61 = vld [vmem:[%s1850_s9 + $0x68] sm:$0xff] }
 0x3e2   :  { %v696_v52 = vmul.f32 %v694_v17, %v1667_v62  ;;  %923 = vmatpush.msra.mxu3 %v716_v61  ;;  %757 = vmatpush.msra.mxu0 %v716_v61  ;;  %v715_v62 = vld [vmem:[%s1850_s9 + $0x60] sm:$0xff] }
 0x3e3   :  { %v555_v19 = vmul.f32 %v554_v45, %v552_v12  ;;  %v938_v61 = vld [vmem:[%s1851_s10] ss:$0 sm:$0xff] }
 0x3e4   :  { %v699_v20 = vmul.f32 %v697_v23, %v696_v52  ;;  %924 = vmatpush.msra.mxu3 %v715_v62  ;;  %758 = vmatpush.msra.mxu0 %v715_v62  ;;  %v714_v23 = vld [vmem:[%s1850_s9 + $0x58] sm:$0xff] }
 0x3e5   :  { %v558_v22 = vadd.f32 %v557_v15, %v555_v19 }
 0x3e6   :  { %v702_v59 = vadd.f32 %v700_v16, %v699_v20  ;;  %925 = vmatpush.msra.mxu3 %v714_v23  ;;  %759 = vmatpush.msra.mxu0 %v714_v23  ;;  %v713_v16 = vld [vmem:[%s1850_s9 + $0x50] sm:$0xff] }
 0x3e7   :  { %794 = vmatmul.f32.vlgmr.msra.gmra.mxu1 %v558_v22 }
 0x3e8   :  { %820 = vmatmul.f32.gmra.mxu2 %v702_v59  ;;  %926 = vmatpush.msra.mxu3 %v713_v16 }
 0x3e9   :  { %760 = vmatpush.msra.mxu0 %v713_v16  ;;  %v825_v16 = vld [vmem:[%s1854_s2 + $0x8] sm:$0xff] }
 0x3ea   :  { %927 = vmatpush.msra.mxu3 %v712_v9 }
 0x3eb   :  { %761 = vmatpush.msra.mxu0 %v712_v9  ;;  %v824_v9 = vld [vmem:[%s1854_s2] sm:$0xff] }
 0x3ec   :  { %928 = vmatpush.msra.mxu3 %v711_v13 }
 0x3ed   :  { %762 = vmatpush.msra.mxu0 %v711_v13 }
 0x3ee   :  { %929 = vmatpush.msra.mxu3 %v710_v41 }
 0x3ef   :  { %763 = vmatpush.msra.mxu0 %v710_v41 }
 0x3f0   :  { %930 = vmatpush.msra.mxu3 %v709_v8 }
 0x3f1   :  { %764 = vmatpush.msra.mxu0 %v709_v8  ;;  %v939_v8 = vld [vmem:[%s1852_s11] ss:$0 sm:$0xff] }
 0x3f2   :  { %931 = vmatpush.msra.mxu3 %v708_v10 }
 0x3f3   :  { %765 = vmatpush.msra.mxu0 %v708_v10 }
 0x3f4   :  { %932 = vmatpush.msra.mxu3 %v707_v14 }
 0x3f5   :  { %766 = vmatpush.msra.mxu0 %v707_v14  ;;  %v940_v14 = vld [vmem:[%s1853_s12] ss:$0 sm:$0xff] }
 0x3f6   :  { %933 = vmatpush.msra.mxu3 %v706_v24  ;;  %v818_v59 = vpop.f32.mrf.mxu2 }
 0x3f7   :  { %767 = vmatpush.msra.mxu0 %v706_v24 }
 0x3f8   :  { %934 = vmatpush.msra.mxu3 %v705_v25 }
 0x3f9   :  { %768 = vmatpush.msra.mxu0 %v705_v25 }
 0x3fa   :  { %935 = vmatpush.msra.mxu3 %v704_v26 }
 0x3fb   :  { %769 = vmatpush.msra.mxu0 %v704_v26 }
 0x3fc   :  { %936 = vmatpush.msra.mxu3 %v703_v27 }
 0x3fd   :  { %770 = vmatpush.msra.mxu0 %v703_v27 }
 0x436   :  { %v384_v28 = vpop.xlane.xlu1 %383 }
 0x437   :  { %v386_v32 = vmul.f32 0.03125, %v384_v28 }
 0x439   :  { %v388_v35 = vadd.f32 1e-05, %v386_v32 }
 0x43b   :  { %959 = vrsqrt.f32 %v388_v35  ;;  %vm405_vm13 = vweird.f32 %v388_v35 }
 0x43e   :  { %v382_v31 = vpop.xlane.xlu1 %381  ;;  %v527_v34 = vpop.xlane.xlu2 %526 }
 0x43f   :  { %v385_v37 = vmul.f32 0.03125, %v382_v31  ;;  %v529_v40 = vmul.f32 0.03125, %v527_v34 }
 0x441   :  { %v960_v2 = vpop.eup %959  ;;  %v387_v21 = vadd.f32 1e-05, %v385_v37  ;;  %v531_v55 = vadd.f32 1e-05, %v529_v40 }
 0x442   :  { %v400_v47 = vmul.f32 %v960_v2, %v388_v35  ;;  %vm406_vm12 = vweird.f32 %v960_v2 }
 0x443   :  { %961 = vrsqrt.f32 %v387_v21  ;;  %vm407_vm14 = vmor %vm405_vm13, %vm406_vm12  ;;  %vm395_vm1 = vweird.f32 %v387_v21  ;;  %vm548_vm3 = vweird.f32 %v531_v55 }
 0x444   :  { %v401_v50 = vmul.f32 %v960_v2, %v400_v47  ;;  %963 = vrsqrt.f32 %v531_v55 }
 0x446   :  { %v402_v30 = vmul.f32 0.5, %v401_v50 }
 0x448   :  { %v403_v38 = vsub.f32 1.5, %v402_v30 }
 0x449   :  { %v962_v57 = vpop.eup %961 }
 0x44a   :  { %v964_v36 = vpop.eup %963  ;;  %v404_v6 = vmul.f32 %v960_v2, %v403_v38  ;;  %v390_v58 = vmul.f32 %v962_v57, %v387_v21  ;;  %vm396_vm15 = vweird.f32 %v962_v57 }
 0x44b   :  { %v543_v49 = vmul.f32 %v964_v36, %v531_v55  ;;  %vm549_vm0 = vweird.f32 %v964_v36  ;;  %vm397_vm2 = vmor %vm395_vm1, %vm396_vm15 }
 0x44c   :  { %v408_v60 = vsel %vm407_vm14, %v960_v2, %v404_v6  ;;  %v391_v18 = vmul.f32 %v962_v57, %v390_v58  ;;  %vm550_vm4 = vmor %vm548_vm3, %vm549_vm0 }
 0x44d   :  { %v410_v43 = vmul.f32 %v408_v60, %v1719_v29  ;;  %v544_v44 = vmul.f32 %v964_v36, %v543_v49 }
 0x44e   :  { %v392_v63 = vmul.f32 0.5, %v391_v18 }
 0x44f   :  { %v545_v0 = vmul.f32 0.5, %v544_v44  ;;  %v413_v42 = vmul.f32 %v411_v51, %v410_v43 }
 0x450   :  { %v393_v53 = vsub.f32 1.5, %v392_v63 }
 0x451   :  { %v546_v1 = vsub.f32 1.5, %v545_v0  ;;  %v416_v3 = vadd.f32 %v414_v33, %v413_v42 }
 0x452   :  { %v394_v4 = vmul.f32 %v962_v57, %v393_v53 }
 0x453   :  { %v547_v5 = vmul.f32 %v964_v36, %v546_v1  ;;  %774 = vmatmul.f32.vlgmr.msra.gmra.mxu3 %v416_v3 }
 0x454   :  { %v398_v7 = vsel %vm397_vm2, %v962_v57, %v394_v4 }
 0x455   :  { %v409_v29 = vmul.f32 %v398_v7, %v1740_v54  ;;  %v551_v48 = vsel %vm550_vm4, %v964_v36, %v547_v5 }
 0x456   :  { %v553_v12 = vmul.f32 %v551_v48, %v1743_v56 }
 0x457   :  { %v412_v17 = vmul.f32 %v411_v51, %v409_v29 }
 0x458   :  { %v556_v52 = vmul.f32 %v554_v45, %v553_v12 }
 0x459   :  { %v415_v19 = vadd.f32 %v414_v33, %v412_v17 }
 0x45a   :  { %v559_v20 = vadd.f32 %v557_v15, %v556_v52 }
 0x45b   :  { %771 = vmatmul.f32.vlgmr.msra.gmra.mxu0 %v415_v19 }
 0x45c   :  { %797 = vmatmul.f32.gmra.mxu1 %v559_v20 }
 0x464   :  { %v795_v22 = vpop.f32.mrf.mxu1 }
 0x46b   :  { %v821_v15 = vpop.f32.mrf.mxu2 }
 0x4d6   :  { %v775_v54 = vpop.f32.mrf.mxu3 }
 0x4d7   :  { %v776_v62 = vadd.f32 %v938_v61, %v775_v54 }
 0x4d8   :  { %v772_v39 = vpop.f32.mrf.mxu0 }
 0x4d9   :  { %v773_v56 = vadd.f32 %v938_v61, %v772_v39  ;;  %v798_v45 = vpop.f32.mrf.mxu1 }
 0x4da   :  { %v799_v46 = vadd.f32 %v798_v45, %v776_v62 }
 0x4db   :  { %v796_v23 = vadd.f32 %v795_v22, %v773_v56 }
 0x4dc   :  { %v822_v13 = vadd.f32 %v821_v15, %v799_v46 }
 0x4dd   :  { %v819_v41 = vadd.f32 %v818_v59, %v796_v23 }
 0x4de   :  { %v832_v11 = vadd.f32 %v825_v16, %v822_v13 }
 0x4df   :  { %v831_v10 = vadd.f32 %v824_v9, %v819_v41 }
 0x4e0   :  { %v836_v24 = vsel %vm830_vm9, %v832_v11, %v822_v13 }
 0x4e1   :  { %v835_v25 = vsel %vm830_vm9, %v831_v10, %v819_v41  ;;  %v842_v26 = vmax.f32 %v836_v24, %v939_v8 }
 0x4e2   :  { %v841_v27 = vmax.f32 %v835_v25, %v939_v8 }
 0x4e3   :  { %v848_v28 = vmin.f32 %v842_v26, %v940_v14 }
 0x4e4   :  { %v847_v32 = vmin.f32 %v841_v27, %v940_v14 }
 0x4e5   :  { %851 = vst.msk [vmem:[%s1855_s13 + $0x8] sm:$0xff] %vm849_vm10, %v848_v28 }
 0x4e6   :  { %850 = vst.msk [vmem:[%s1855_s13] sm:$0xff] %vm849_vm10, %v847_v32 }

</bundles_post_ra>
